<compile_context>
chip_gen: v7x
topology: tpu7x:2x2x1
jax: 0.10.0
libtpu: 0.0.40
codegen_flags: <defaults>
</compile_context>

<pallas_src>
import jax
import jax.numpy as jnp
from jax.experimental import pallas as pl
from jax.experimental.pallas import tpu as pltpu

D_IN = 28 * 28      # 784 (== full last dim of the flattened input -> legal block dim)
H = 512
D_OUT = 10
D_OUT_PAD = 128     # lane-dense output (unmasked vst, clean MXU N-tile)


def mlp_kernel(x_ref, w1_ref, b1_ref, w2_ref, b2_ref, w3_ref, b3_ref, o_ref):
    # x tile: (tile_b, 784) f32 -> cast to bf16 in-kernel (no HBM round trip).
    x = x_ref[...].astype(jnp.bfloat16)
    h1 = jnp.dot(x, w1_ref[...], preferred_element_type=jnp.float32) + b1_ref[...]
    h1 = jnp.maximum(h1, 0.0).astype(jnp.bfloat16)   # bias/ReLU in f32; bf16 only as matmul input
    h2 = jnp.dot(h1, w2_ref[...], preferred_element_type=jnp.float32) + b2_ref[...]
    h2 = jnp.maximum(h2, 0.0).astype(jnp.bfloat16)
    logits = jnp.dot(h2, w3_ref[...], preferred_element_type=jnp.float32) + b3_ref[...]
    o_ref[...] = logits                              # (tile_b, 128) f32, lane-dense store


def prepare_params(w1, b1, w2, b2, w3, b3):
    """One-time parameter conversion (do NOT call per forward pass).

    w*: (in_features, out_features) f32 (transpose of PyTorch nn.Linear.weight),
    b*: (out_features,) f32.
    Returns kernel-ready bf16 weights (layer-3 cols zero-padded to 128) and f32 biases.
    """
    w1_k = w1.astype(jnp.bfloat16)                                       # (784, 512)
    w2_k = w2.astype(jnp.bfloat16)                                       # (512, 512)
    w3_k = (jnp.zeros((H, D_OUT_PAD), jnp.bfloat16)
            .at[:, :D_OUT].set(w3.astype(jnp.bfloat16)))                 # (512, 128)
    b1_k = b1.reshape(1, H).astype(jnp.float32)
    b2_k = b2.reshape(1, H).astype(jnp.float32)
    b3_k = (jnp.zeros((1, D_OUT_PAD), jnp.float32)
            .at[:, :D_OUT].set(b3.reshape(1, D_OUT).astype(jnp.float32)))
    return w1_k, b1_k, w2_k, b2_k, w3_k, b3_k


def _round_up(n, m):
    return -(-n // m) * m


def _pick_tile_b(B):
    # Large tiles amortize the ~0.35 us per-grid-step overhead (same policy on
    # v5e/v6e/v7x — the MXU M-dim does not need to match the systolic array size),
    # but cap at half the batch (rounded to a sublane multiple) so the grid has
    # >= 2 steps and v7x's second TensorCore gets work. Cap at 512 to bound VMEM.
    if B <= 8:
        return 8
    half = _round_up(_round_up(B, 2) // 2, 8)
    return max(8, min(512, half))


def mlp_forward(x, params, *, tile_b=None):
    """x: (B, 28, 28) or (B, 1, 28, 28) f32; params from prepare_params().
    Returns logits (B, 10) float32."""
    w1_k, b1_k, w2_k, b2_k, w3_k, b3_k = params
    B = x.shape[0]
    x_flat = x.reshape(B, -1).astype(jnp.float32)    # nn.Flatten; reshape is free
    assert x_flat.shape[1] == D_IN

    if tile_b is None:
        tile_b = _pick_tile_b(B)
    grid = pl.cdiv(B, tile_b)                        # ragged tail block allowed

    # Weights/biases: constant index_map -> loaded once, VMEM-resident across the grid.
    resident = lambda shape: pl.BlockSpec(shape, lambda i: (0, 0))

    out = pl.pallas_call(
        mlp_kernel,
        out_shape=jax.ShapeDtypeStruct((B, D_OUT_PAD), jnp.float32),
        grid_spec=pltpu.PrefetchScalarGridSpec(
            num_scalar_prefetch=0,
            grid=(grid,),
            in_specs=[
                pl.BlockSpec((tile_b, D_IN), lambda i: (i, 0)),       # x: tiled over batch
                resident((D_IN, H)), resident((1, H)),                # layer 1
                resident((H, H)),    resident((1, H)),                # layer 2
                resident((H, D_OUT_PAD)), resident((1, D_OUT_PAD)),   # layer 3 (padded N)
            ],
            out_specs=pl.BlockSpec((tile_b, D_OUT_PAD), lambda i: (i, 0)),
        ),
        compiler_params=pltpu.CompilerParams(
            # Batch tiles are independent -> shard across v7x's 2 TensorCores
            # (harmless no-op on single-TC v5e/v6e).
            dimension_semantics=("parallel",)),
    )(x_flat, w1_k, b1_k, w2_k, b2_k, w3_k, b3_k)

    return out[:, :D_OUT]


def init_params(key):
    """Deterministic init mimicking nn.Linear's U(-1/sqrt(fan_in), 1/sqrt(fan_in))."""
    def linear(k, fan_in, fan_out):
        kw, kb = jax.random.split(k)
        bound = 1.0 / jnp.sqrt(fan_in)
        # stored as (in, out) == transpose of PyTorch's (out, in) weight
        w = jax.random.uniform(kw, (fan_in, fan_out), jnp.float32, -bound, bound)
        b = jax.random.uniform(kb, (fan_out,), jnp.float32, -bound, bound)
        return w, b

    k1, k2, k3 = jax.random.split(key, 3)
    w1, b1 = linear(k1, 28 * 28, 512)
    w2, b2 = linear(k2, 512, 512)
    w3, b3 = linear(k3, 512, 10)
    return w1, b1, w2, b2, w3, b3


if __name__ == "__main__":
    key = jax.random.PRNGKey(0)
    kx, kp = jax.random.split(key)

    B = 8
    x = jax.random.normal(kx, (B, 28, 28), jnp.float32)
    w1, b1, w2, b2, w3, b3 = init_params(kp)

    # One-time parameter conversion (hoisted out of the per-call path).
    params = prepare_params(w1, b1, w2, b2, w3, b3)

    logits = mlp_forward(x, params)
    jax.block_until_ready(logits)
    assert logits.shape == (B, D_OUT)

    # Reference in plain JAX: same bf16 quantization of matmul inputs, f32 math.
    q = lambda a: a.astype(jnp.bfloat16).astype(jnp.float32)
    xf = q(x.reshape(B, -1))
    h1 = jnp.maximum(xf @ q(w1) + b1, 0.0)
    h2 = jnp.maximum(q(h1) @ q(w2) + b2, 0.0)
    ref = q(h2) @ q(w3) + b3
    assert jnp.allclose(logits, ref, atol=1e-2, rtol=1e-2)

    # Loose sanity check against the full-f32 forward (module semantics).
    xf32 = x.reshape(B, -1)
    ref32 = jnp.maximum(xf32 @ w1 + b1, 0.0)
    ref32 = jnp.maximum(ref32 @ w2 + b2, 0.0)
    ref32 = ref32 @ w3 + b3
    assert jnp.allclose(logits, ref32, atol=5e-2, rtol=5e-2)

    print("KERNEL_OK")
</pallas_src>

<mosaic_0001>
module attributes {stable_mosaic.version = 11 : i64} {
  func.func @mlp_kernel(%arg0: i32, %arg1: memref<8x784xf32, #tpu.memory_space<vmem>>, %arg2: memref<784x512xbf16, #tpu.memory_space<vmem>>, %arg3: memref<1x512xf32, #tpu.memory_space<vmem>>, %arg4: memref<512x512xbf16, #tpu.memory_space<vmem>>, %arg5: memref<1x512xf32, #tpu.memory_space<vmem>>, %arg6: memref<512x128xbf16, #tpu.memory_space<vmem>>, %arg7: memref<1x128xf32, #tpu.memory_space<vmem>>, %arg8: memref<8x128xf32, #tpu.memory_space<vmem>>) attributes {dimension_semantics = [#tpu.dimension_semantics<parallel>], iteration_bounds = array<i64: 1>, scalar_prefetch = 0 : i64, scratch_operands = 0 : i64, tpu.core_type = #tpu.core_type<tc>, window_params = [{transform_indices = @transform_0, window_bounds = array<i64: 8, 784>}, {pipeline_mode = #tpu.pipeline_mode<synchronous>, transform_indices = @transform_1, window_bounds = array<i64: 784, 512>}, {pipeline_mode = #tpu.pipeline_mode<synchronous>, transform_indices = @transform_2, window_bounds = array<i64: 1, 512>}, {pipeline_mode = #tpu.pipeline_mode<synchronous>, transform_indices = @transform_3, window_bounds = array<i64: 512, 512>}, {pipeline_mode = #tpu.pipeline_mode<synchronous>, transform_indices = @transform_4, window_bounds = array<i64: 1, 512>}, {pipeline_mode = #tpu.pipeline_mode<synchronous>, transform_indices = @transform_5, window_bounds = array<i64: 512, 128>}, {pipeline_mode = #tpu.pipeline_mode<synchronous>, transform_indices = @transform_6, window_bounds = array<i64: 1, 128>}, {transform_indices = @transform_7, window_bounds = array<i64: 8, 128>}]} {
    %c0 = arith.constant 0 : index
    %c0_0 = arith.constant 0 : index
    %0 = vector.load %arg1[%c0, %c0_0] : memref<8x784xf32, #tpu.memory_space<vmem>>, vector<8x784xf32>
    %1 = arith.truncf %0 : vector<8x784xf32> to vector<8x784xbf16>
    %c0_1 = arith.constant 0 : index
    %c0_2 = arith.constant 0 : index
    %2 = vector.load %arg2[%c0_1, %c0_2] : memref<784x512xbf16, #tpu.memory_space<vmem>>, vector<784x512xbf16>
    %cst = arith.constant dense<0.000000e+00> : vector<8x512xf32>
    %3 = tpu.matmul %1, %2, %cst {dimension_numbers = #tpu.dot_dimension_numbers<[1], [0], [0], [1], [0, 0, 1, 1], [], []>} : vector<8x784xbf16>, vector<784x512xbf16>, vector<8x512xf32> -> vector<8x512xf32>
    %c0_3 = arith.constant 0 : index
    %c0_4 = arith.constant 0 : index
    %4 = vector.load %arg3[%c0_3, %c0_4] : memref<1x512xf32, #tpu.memory_space<vmem>>, vector<1x512xf32>
    %5 = vector.broadcast %4 : vector<1x512xf32> to vector<8x512xf32>
    %6 = arith.addf %3, %5 : vector<8x512xf32>
    %cst_5 = arith.constant 0.000000e+00 : f32
    %7 = vector.broadcast %cst_5 : f32 to vector<8x512xf32>
    %8 = arith.maximumf %6, %7 : vector<8x512xf32>
    %9 = arith.truncf %8 : vector<8x512xf32> to vector<8x512xbf16>
    %c0_6 = arith.constant 0 : index
    %c0_7 = arith.constant 0 : index
    %10 = vector.load %arg4[%c0_6, %c0_7] : memref<512x512xbf16, #tpu.memory_space<vmem>>, vector<512x512xbf16>
    %cst_8 = arith.constant dense<0.000000e+00> : vector<8x512xf32>
    %11 = tpu.matmul %9, %10, %cst_8 {dimension_numbers = #tpu.dot_dimension_numbers<[1], [0], [0], [1], [0, 0, 1, 1], [], []>} : vector<8x512xbf16>, vector<512x512xbf16>, vector<8x512xf32> -> vector<8x512xf32>
    %c0_9 = arith.constant 0 : index
    %c0_10 = arith.constant 0 : index
    %12 = vector.load %arg5[%c0_9, %c0_10] : memref<1x512xf32, #tpu.memory_space<vmem>>, vector<1x512xf32>
    %13 = vector.broadcast %12 : vector<1x512xf32> to vector<8x512xf32>
    %14 = arith.addf %11, %13 : vector<8x512xf32>
    %cst_11 = arith.constant 0.000000e+00 : f32
    %15 = vector.broadcast %cst_11 : f32 to vector<8x512xf32>
    %16 = arith.maximumf %14, %15 : vector<8x512xf32>
    %17 = arith.truncf %16 : vector<8x512xf32> to vector<8x512xbf16>
    %c0_12 = arith.constant 0 : index
    %c0_13 = arith.constant 0 : index
    %18 = vector.load %arg6[%c0_12, %c0_13] : memref<512x128xbf16, #tpu.memory_space<vmem>>, vector<512x128xbf16>
    %cst_14 = arith.constant dense<0.000000e+00> : vector<8x128xf32>
    %19 = tpu.matmul %17, %18, %cst_14 {dimension_numbers = #tpu.dot_dimension_numbers<[1], [0], [0], [1], [0, 0, 1, 1], [], []>} : vector<8x512xbf16>, vector<512x128xbf16>, vector<8x128xf32> -> vector<8x128xf32>
    %c0_15 = arith.constant 0 : index
    %c0_16 = arith.constant 0 : index
    %20 = vector.load %arg7[%c0_15, %c0_16] : memref<1x128xf32, #tpu.memory_space<vmem>>, vector<1x128xf32>
    %21 = vector.broadcast %20 : vector<1x128xf32> to vector<8x128xf32>
    %22 = arith.addf %19, %21 : vector<8x128xf32>
    %c0_17 = arith.constant 0 : index
    %c0_18 = arith.constant 0 : index
    %23 = vector.load %arg8[%c0_17, %c0_18] : memref<8x128xf32, #tpu.memory_space<vmem>>, vector<8x128xf32>
    tpu.vector_store %arg8[%c0_17, %c0_18], %22 {strides = array<i32>} : memref<8x128xf32, #tpu.memory_space<vmem>>, vector<8x128xf32>,
    return
  }
  func.func @transform_0(%arg0: i32) -> (i32, i32) {
    %c0_i32 = arith.constant 0 : i32
    %c0_i32_0 = arith.constant 0 : i32
    return %arg0, %c0_i32 : i32, i32
  }
  func.func @transform_1(%arg0: i32) -> (i32, i32) {
    %c0_i32 = arith.constant 0 : i32
    %c0_i32_0 = arith.constant 0 : i32
    %c0_i32_1 = arith.constant 0 : i32
    return %c0_i32, %c0_i32_0 : i32, i32
  }
  func.func @transform_2(%arg0: i32) -> (i32, i32) {
    %c0_i32 = arith.constant 0 : i32
    %c0_i32_0 = arith.constant 0 : i32
    %c0_i32_1 = arith.constant 0 : i32
    return %c0_i32, %c0_i32_0 : i32, i32
  }
  func.func @transform_3(%arg0: i32) -> (i32, i32) {
    %c0_i32 = arith.constant 0 : i32
    %c0_i32_0 = arith.constant 0 : i32
    %c0_i32_1 = arith.constant 0 : i32
    return %c0_i32, %c0_i32_0 : i32, i32
  }
  func.func @transform_4(%arg0: i32) -> (i32, i32) {
    %c0_i32 = arith.constant 0 : i32
    %c0_i32_0 = arith.constant 0 : i32
    %c0_i32_1 = arith.constant 0 : i32
    return %c0_i32, %c0_i32_0 : i32, i32
  }
  func.func @transform_5(%arg0: i32) -> (i32, i32) {
    %c0_i32 = arith.constant 0 : i32
    %c0_i32_0 = arith.constant 0 : i32
    %c0_i32_1 = arith.constant 0 : i32
    return %c0_i32, %c0_i32_0 : i32, i32
  }
  func.func @transform_6(%arg0: i32) -> (i32, i32) {
    %c0_i32 = arith.constant 0 : i32
    %c0_i32_0 = arith.constant 0 : i32
    %c0_i32_1 = arith.constant 0 : i32
    return %c0_i32, %c0_i32_0 : i32, i32
  }
  func.func @transform_7(%arg0: i32) -> (i32, i32) {
    %c0_i32 = arith.constant 0 : i32
    %c0_i32_0 = arith.constant 0 : i32
    return %arg0, %c0_i32 : i32, i32
  }
}

</mosaic_0001>

<bundles_post_ra>
// kernel: tpu_custom_call.1
= control target key start
LH: loop header
LB: loop body
LE: loop exit
PB: predicated region body
PF: predicated region fallthrough
CT: control target
= control target key end

     0   :  { %12 = vsyncpa [#allocation3], 0  ;;  %s4201_s0 = inlined_call_operand.hbm [shape: f32[8,784], index: 0, kind: input, shape index: {}]   ;;  %s4202_s1 = inlined_call_operand.hbm [shape: bf16[784,512], index: 1, kind: input, shape index: {}]   ;;  %s4203_s2 = inlined_call_operand.vmem [shape: f32[1,512], index: 2, kind: input, shape index: {}]   ;;  %s4204_s3 = inlined_call_operand.hbm [shape: bf16[512,512], index: 3, kind: input, shape index: {}]   ;;  %s4205_s4 = inlined_call_operand.vmem [shape: f32[1,512], index: 4, kind: input, shape index: {}]   ;;  %s4206_s5 = inlined_call_operand.hbm [shape: bf16[512,128], index: 5, kind: input, shape index: {}]   ;;  %s4207_s6 = inlined_call_operand.vmem [shape: f32[1,128], index: 6, kind: input, shape index: {}]   ;;  %s4208_s7 = inlined_call_operand.hbm [shape: f32[8,128], index: 7, kind: output, shape index: {}]  }
   0x1   :  { %13 = vsyncpa [#allocation6], 0 }
   0x2   :  { %14 = vsyncpa [#allocation9], 0 }
   0x3   :  { %15 = vsyncpa [#allocation4], 0  ;;  %s4045_s24 = smov [#allocation5]   ;;  %s3927_s28 = scalar_lea.hbm %s4202_s1, 25088 }
   0x4   :  { %s31_s25 = sshll.u32 %s4045_s24, 4  ;;  %p3928_p0 = scmp.ne.s32.totalorder %s4202_s1, %s3927_s28  ;;  %s32_s25 = int_to_ptr.vmem [resolvable:$true] %s31_s25 }
   0x5   :  { %p3931_p1 = scmp.lt.u32.totalorder %s3927_s28, %s4202_s1 }
   0x7   :  { %p3933_p2 = pnand %p3931_p1, %p3928_p0 }
   0x9   :  { %3936 = shalt.err (!%p3933_p2)
}
   0xa   :  { %s3937_s10 = scalar_lea.vmem %s32_s25, 25088  ;;  %p3942_p4 = scmp.lt.s32.totalorder %s32_s25, %s32_s25 }
   0xb   :  { %p3938_p3 = scmp.ne.s32.totalorder %s32_s25, %s3937_s10  ;;  %p3943_p5 = scmp.lt.s32.totalorder %s3937_s10, %s3937_s10 }
   0xd   :  { %p3944_p6 = por %p3943_p5, %p3942_p4 }
   0xf   :  { %p3945_p7 = pnand %p3944_p6, %p3938_p3 }
  0x11   :  { %3948 = shalt.err (!%p3945_p7)
}
  0x12   :  { %s4046_s11 = smov 256   ;;  %s4047_s12 = smov 16  }
  0x13   :  { %37 = dma.hbm_to_vmem [thread:$0]  %s4202_s1, 25088, %s32_s25, [#allocation6], %s4046_s11, %s4046_s11, %s4047_s12  }
  0x14   :  { %s4048_s15 = smov [#allocation2]   ;;  %s4049_s17 = smov [#allocation7]  }
  0x15   :  { %s22_s16 = sshll.u32 %s4048_s15, 4  ;;  %s45_s18 = sshll.u32 %s4049_s17, 4  ;;  %s23_s16 = int_to_ptr.vmem [resolvable:$true] %s22_s16  ;;  %s46_s18 = int_to_ptr.vmem [resolvable:$true] %s45_s18 }
  0x16   :  { %s3949_s21 = scalar_lea.hbm %s4201_s0, 896 }
  0x17   :  { %p3950_p8 = scmp.ne.s32.totalorder %s4201_s0, %s3949_s21  ;;  %p3953_p9 = scmp.lt.u32.totalorder %s3949_s21, %s4201_s0 }
  0x19   :  { %p3955_p10 = pnand %p3953_p9, %p3950_p8 }
  0x1b   :  { %3958 = shalt.err (!%p3955_p10)
}
  0x1c   :  { %s3959_s1 = scalar_lea.vmem %s23_s16, 896  ;;  %p3964_p12 = scmp.lt.s32.totalorder %s23_s16, %s23_s16 }
  0x1d   :  { %p3960_p11 = scmp.ne.s32.totalorder %s23_s16, %s3959_s1  ;;  %p3965_p13 = scmp.lt.s32.totalorder %s3959_s1, %s3959_s1 }
  0x1f   :  { %p3966_p0 = por %p3965_p13, %p3964_p12 }
  0x21   :  { %p3967_p1 = pnand %p3966_p0, %p3960_p11 }
  0x23   :  { %3970 = shalt.err (!%p3967_p1)
}
  0x24   :  { %25 = dma.hbm_to_vmem [thread:$0]  %s4201_s0, 896, %s23_s16, [#allocation3]  }
  0x25   :  { %s3971_s30 = scalar_lea.hbm %s4204_s3, 16384 }
  0x26   :  { %p3972_p2 = scmp.ne.s32.totalorder %s4204_s3, %s3971_s30  ;;  %p3975_p3 = scmp.lt.u32.totalorder %s3971_s30, %s4204_s3 }
  0x28   :  { %p3977_p4 = pnand %p3975_p3, %p3972_p2 }
  0x2a   :  { %3980 = shalt.err (!%p3977_p4)
}
  0x2b   :  { %s3981_s14 = scalar_lea.vmem %s46_s18, 16384  ;;  %p3986_p6 = scmp.lt.s32.totalorder %s46_s18, %s46_s18 }
  0x2c   :  { %p3982_p5 = scmp.ne.s32.totalorder %s46_s18, %s3981_s14  ;;  %p3987_p7 = scmp.lt.s32.totalorder %s3981_s14, %s3981_s14 }
  0x2e   :  { %p3988_p8 = por %p3987_p7, %p3986_p6 }
  0x30   :  { %p3989_p9 = pnand %p3988_p8, %p3982_p5 }
  0x32   :  { %3992 = shalt.err (!%p3989_p9)
}
  0x33   :  { %51 = dma.hbm_to_vmem [thread:$0]  %s4204_s3, 16384, %s46_s18, [#allocation6], %s4046_s11, %s4046_s11, %s4047_s12  }
  0x34   :  { %s4050_s16 = smov [#allocation8]   ;;  %s3993_s21 = scalar_lea.hbm %s4206_s5, 4096 }
  0x35   :  { %s59_s17 = sshll.u32 %s4050_s16, 4  ;;  %p3994_p10 = scmp.ne.s32.totalorder %s4206_s5, %s3993_s21  ;;  %s60_s17 = int_to_ptr.vmem [resolvable:$true] %s59_s17 }
  0x36   :  { %p3997_p11 = scmp.lt.u32.totalorder %s3993_s21, %s4206_s5 }
  0x38   :  { %p3999_p12 = pnand %p3997_p11, %p3994_p10 }
  0x3a   :  { %4002 = shalt.err (!%p3999_p12)
}
  0x3b   :  { %s4003_s1 = scalar_lea.vmem %s60_s17, 4096  ;;  %p4008_p0 = scmp.lt.s32.totalorder %s60_s17, %s60_s17 }
  0x3c   :  { %p4004_p13 = scmp.ne.s32.totalorder %s60_s17, %s4003_s1  ;;  %p4009_p1 = scmp.lt.s32.totalorder %s4003_s1, %s4003_s1 }
  0x3e   :  { %p4010_p2 = por %p4009_p1, %p4008_p0 }
  0x40   :  { %p4011_p3 = pnand %p4010_p2, %p4004_p13 }
  0x42   :  { %4014 = shalt.err (!%p4011_p3)
}
  0x43   :  { %s4051_s3 = smov 64   ;;  %s4052_s11 = smov 4  }
  0x44   :  { %65 = dma.hbm_to_vmem [thread:$0]  %s4206_s5, 4096, %s60_s17, [#allocation9], %s4051_s3, %s4051_s3, %s4052_s11  }
  0x45   :  { %4037 = dma.done.wait [#allocation3], 896  }
  0x46   :  { %4038 = vsyncadd [#allocation3], 4294966400 }
  0x47   :  { %4039 = dma.done.wait [#allocation6], 41472  }
  0x48   :  { %4040 = vsyncadd [#allocation6], 4294925824 }
  0x49   :  { %4041 = dma.done.wait [#allocation9], 4096  }
  0x4a   :  { %4042 = vsyncadd [#allocation9], 4294963200  ;;  %v3409_v0 = vld [vmem:[#allocation5 + $0x4] ss:$16 sps:$4 sm:$0xff]   ;;  %v3411_v1 = vld [vmem:[#allocation5 + $0xc] ss:$16 sps:$4 sm:$0xff]  }
  0x4b   :  { %1297 = vmatprep.subr.bf16.mxu0 %v3409_v0  ;;  %v3413_v2 = vld [vmem:[#allocation5] ss:$16 sps:$4 sm:$0xff]   ;;  %v3414_v3 = vld [vmem:[#allocation5 + $0x8] ss:$16 sps:$4 sm:$0xff]   ;;  %1461 = vmatprep.subr.bf16.mxu1 %v3411_v1  ;;  %v3415_v4 = vld [vmem:[#allocation5 + $0x24] ss:$16 sps:$4 sm:$0xff]  }
  0x4c   :  { %1298 = vmatpush1.bf16.msra.mxu0 %v3413_v2  ;;  %1462 = vmatpush1.bf16.msra.mxu1 %v3414_v3  ;;  %v3417_v5 = vld [vmem:[#allocation5 + $0x2c] ss:$16 sps:$4 sm:$0xff]   ;;  %v3419_v6 = vld [vmem:[#allocation5 + $0x20] ss:$16 sps:$4 sm:$0xff]   ;;  %v3420_v7 = vld [vmem:[#allocation5 + $0x28] ss:$16 sps:$4 sm:$0xff]  }
  0x4d   :  { %1299 = vmatprep.subr.bf16.mxu0 %v3415_v4  ;;  %1463 = vmatprep.subr.bf16.mxu1 %v3417_v5  ;;  %v3421_v8 = vld [vmem:[#allocation5 + $0x44] ss:$16 sps:$4 sm:$0xff]   ;;  %v3423_v9 = vld [vmem:[#allocation5 + $0x4c] ss:$16 sps:$4 sm:$0xff]   ;;  %v3425_v10 = vld [vmem:[#allocation5 + $0x40] ss:$16 sps:$4 sm:$0xff]  }
  0x4e   :  { %v3426_v11 = vld [vmem:[#allocation5 + $0x48] ss:$16 sps:$4 sm:$0xff]   ;;  %v3427_v12 = vld [vmem:[#allocation5 + $0x64] ss:$16 sps:$4 sm:$0xff]   ;;  %v3429_v13 = vld [vmem:[#allocation5 + $0x6c] ss:$16 sps:$4 sm:$0xff]  }
  0x4f   :  { %v3431_v14 = vld [vmem:[#allocation5 + $0x60] ss:$16 sps:$4 sm:$0xff]   ;;  %v3432_v15 = vld [vmem:[#allocation5 + $0x68] ss:$16 sps:$4 sm:$0xff]   ;;  %v3433_v16 = vld [vmem:[#allocation5 + $0x84] ss:$16 sps:$4 sm:$0xff]  }
  0x50   :  { %1300 = vmatpush1.bf16.msra.mxu0 %v3419_v6  ;;  %1464 = vmatpush1.bf16.msra.mxu1 %v3420_v7  ;;  %v3435_v17 = vld [vmem:[#allocation5 + $0x8c] ss:$16 sps:$4 sm:$0xff]   ;;  %v3437_v18 = vld [vmem:[#allocation5 + $0x80] ss:$16 sps:$4 sm:$0xff]   ;;  %v3438_v19 = vld [vmem:[#allocation5 + $0x88] ss:$16 sps:$4 sm:$0xff]  }
  0x51   :  { %1301 = vmatprep.subr.bf16.mxu0 %v3421_v8  ;;  %1465 = vmatprep.subr.bf16.mxu1 %v3423_v9  ;;  %v3439_v20 = vld [vmem:[#allocation5 + $0xa4] ss:$16 sps:$4 sm:$0xff]   ;;  %v3441_v21 = vld [vmem:[#allocation5 + $0xac] ss:$16 sps:$4 sm:$0xff]   ;;  %v3443_v22 = vld [vmem:[#allocation5 + $0xa0] ss:$16 sps:$4 sm:$0xff]  }
  0x52   :  { %v3444_v23 = vld [vmem:[#allocation5 + $0xa8] ss:$16 sps:$4 sm:$0xff]   ;;  %v3445_v24 = vld [vmem:[#allocation5 + $0xc4] ss:$16 sps:$4 sm:$0xff]   ;;  %v3447_v25 = vld [vmem:[#allocation5 + $0xcc] ss:$16 sps:$4 sm:$0xff]  }
  0x53   :  { %v3449_v26 = vld [vmem:[#allocation5 + $0xc0] ss:$16 sps:$4 sm:$0xff]   ;;  %v3450_v27 = vld [vmem:[#allocation5 + $0xc8] ss:$16 sps:$4 sm:$0xff]   ;;  %v3451_v28 = vld [vmem:[#allocation5 + $0xe4] ss:$16 sps:$4 sm:$0xff]  }
  0x54   :  { %1302 = vmatpush1.bf16.msra.mxu0 %v3425_v10  ;;  %1466 = vmatpush1.bf16.msra.mxu1 %v3426_v11  ;;  %v3453_v29 = vld [vmem:[#allocation5 + $0xec] ss:$16 sps:$4 sm:$0xff]   ;;  %v3455_v30 = vld [vmem:[#allocation5 + $0xe0] ss:$16 sps:$4 sm:$0xff]   ;;  %v3456_v31 = vld [vmem:[#allocation5 + $0xe8] ss:$16 sps:$4 sm:$0xff]  }
  0x55   :  { %1303 = vmatprep.subr.bf16.mxu0 %v3427_v12  ;;  %1467 = vmatprep.subr.bf16.mxu1 %v3429_v13  ;;  %v3457_v32 = vld [vmem:[#allocation5 + $0x104] ss:$16 sps:$4 sm:$0xff]   ;;  %v3459_v33 = vld [vmem:[#allocation5 + $0x10c] ss:$16 sps:$4 sm:$0xff]   ;;  %v3461_v34 = vld [vmem:[#allocation5 + $0x100] ss:$16 sps:$4 sm:$0xff]  }
  0x56   :  { %v3462_v35 = vld [vmem:[#allocation5 + $0x108] ss:$16 sps:$4 sm:$0xff]   ;;  %v3463_v36 = vld [vmem:[#allocation5 + $0x124] ss:$16 sps:$4 sm:$0xff]   ;;  %v3465_v37 = vld [vmem:[#allocation5 + $0x12c] ss:$16 sps:$4 sm:$0xff]  }
  0x57   :  { %v3467_v38 = vld [vmem:[#allocation5 + $0x120] ss:$16 sps:$4 sm:$0xff]   ;;  %v3468_v39 = vld [vmem:[#allocation5 + $0x128] ss:$16 sps:$4 sm:$0xff]   ;;  %v3469_v40 = vld [vmem:[#allocation5 + $0x144] ss:$16 sps:$4 sm:$0xff]  }
  0x58   :  { %1304 = vmatpush1.bf16.msra.mxu0 %v3431_v14  ;;  %1468 = vmatpush1.bf16.msra.mxu1 %v3432_v15  ;;  %v3471_v41 = vld [vmem:[#allocation5 + $0x14c] ss:$16 sps:$4 sm:$0xff]   ;;  %v3473_v42 = vld [vmem:[#allocation5 + $0x140] ss:$16 sps:$4 sm:$0xff]   ;;  %v3474_v43 = vld [vmem:[#allocation5 + $0x148] ss:$16 sps:$4 sm:$0xff]  }
  0x59   :  { %1305 = vmatprep.subr.bf16.mxu0 %v3433_v16  ;;  %1469 = vmatprep.subr.bf16.mxu1 %v3435_v17  ;;  %v3475_v44 = vld [vmem:[#allocation5 + $0x164] ss:$16 sps:$4 sm:$0xff]   ;;  %v3477_v45 = vld [vmem:[#allocation5 + $0x16c] ss:$16 sps:$4 sm:$0xff]   ;;  %v3479_v47 = vld [vmem:[#allocation5 + $0x160] ss:$16 sps:$4 sm:$0xff]  }
  0x5a   :  { %v82_v46 = vld [vmem:[#allocation2 + $0x8] sm:$0xff]  ;;  %v3480_v49 = vld [vmem:[#allocation5 + $0x168] ss:$16 sps:$4 sm:$0xff]   ;;  %v3483_v51 = vld [vmem:[#allocation5 + $0x18c] ss:$16 sps:$4 sm:$0xff]   ;;  %vm1293_vm0 = vcmask 130048  }
  0x5b   :  { %v89_v48 = vpack.c.bf16 %v82_v46, %v82_v46  ;;  %v3481_v50 = vld [vmem:[#allocation5 + $0x184] ss:$16 sps:$4 sm:$0xff]   ;;  %v3485_v52 = vld [vmem:[#allocation5 + $0x180] ss:$16 sps:$4 sm:$0xff]   ;;  %v3486_v53 = vld [vmem:[#allocation5 + $0x188] ss:$16 sps:$4 sm:$0xff]  }
  0x5c   :  { %1306 = vmatpush1.bf16.msra.mxu0 %v3437_v18  ;;  %1470 = vmatpush1.bf16.msra.mxu1 %v3438_v19  ;;  %v3487_v54 = vld [vmem:[#allocation5 + $0x1a4] ss:$16 sps:$4 sm:$0xff]   ;;  %v3489_v55 = vld [vmem:[#allocation5 + $0x1ac] ss:$16 sps:$4 sm:$0xff]   ;;  %v3491_v56 = vld [vmem:[#allocation5 + $0x1a0] ss:$16 sps:$4 sm:$0xff]  }
  0x5d   :  { %1307 = vmatprep.subr.bf16.mxu0 %v3439_v20  ;;  %1471 = vmatprep.subr.bf16.mxu1 %v3441_v21  ;;  %v3492_v57 = vld [vmem:[#allocation5 + $0x1a8] ss:$16 sps:$4 sm:$0xff]   ;;  %v3493_v58 = vld [vmem:[#allocation5 + $0x1c4] ss:$16 sps:$4 sm:$0xff]   ;;  %v3495_v59 = vld [vmem:[#allocation5 + $0x1cc] ss:$16 sps:$4 sm:$0xff]  }
  0x5e   :  { %1329 = vmatprep.mubr.bf16.mxu0 %v89_v48  ;;  %1493 = vmatprep.mubr.bf16.mxu1 %v89_v48  ;;  %v3497_v60 = vld [vmem:[#allocation5 + $0x1c0] ss:$16 sps:$4 sm:$0xff]   ;;  %v3498_v61 = vld [vmem:[#allocation5 + $0x1c8] ss:$16 sps:$4 sm:$0xff]   ;;  %v3499_v62 = vld [vmem:[#allocation5 + $0x1e4] ss:$16 sps:$4 sm:$0xff]  }
  0x5f   :  { %v3501_v63 = vld [vmem:[#allocation5 + $0x1ec] ss:$16 sps:$4 sm:$0xff]   ;;  %v3503_v0 = vld [vmem:[#allocation5 + $0x1e0] ss:$16 sps:$4 sm:$0xff]   ;;  %v3504_v1 = vld [vmem:[#allocation5 + $0x1e8] ss:$16 sps:$4 sm:$0xff]  }
  0x60   :  { %1308 = vmatpush1.bf16.msra.mxu0 %v3443_v22  ;;  %1472 = vmatpush1.bf16.msra.mxu1 %v3444_v23  ;;  %v81_v2 = vld [vmem:[#allocation2] sm:$0xff]  ;;  %v3507_v3 = vld [vmem:[#allocation5 + $0x204] ss:$16 sps:$4 sm:$0xff]   ;;  %v3505_v6 = vld [vmem:[#allocation5 + $0x200] ss:$16 sps:$4 sm:$0xff]   ;;  %s4054_s29 = smov [#allocation10]  }
  0x61   :  { %1309 = vmatprep.subr.bf16.mxu0 %v3445_v24  ;;  %1473 = vmatprep.subr.bf16.mxu1 %v3447_v25  ;;  %v3510_v4 = vld [vmem:[#allocation5 + $0x20c] ss:$16 sps:$4 sm:$0xff]   ;;  %v88_v5 = vpack.c.bf16 %v81_v2, %v81_v2  ;;  %v3508_v7 = vld [vmem:[#allocation5 + $0x208] ss:$16 sps:$4 sm:$0xff]   ;;  %v3513_v8 = vld [vmem:[#allocation5 + $0x224] ss:$16 sps:$4 sm:$0xff]  }
  0x62   :  { %v3516_v9 = vld [vmem:[#allocation5 + $0x22c] ss:$16 sps:$4 sm:$0xff]   ;;  %v3511_v10 = vld [vmem:[#allocation5 + $0x220] ss:$16 sps:$4 sm:$0xff]   ;;  %v3514_v11 = vld [vmem:[#allocation5 + $0x228] ss:$16 sps:$4 sm:$0xff]  }
  0x63   :  { %v3519_v12 = vld [vmem:[#allocation5 + $0x244] ss:$16 sps:$4 sm:$0xff]   ;;  %v3522_v13 = vld [vmem:[#allocation5 + $0x24c] ss:$16 sps:$4 sm:$0xff]   ;;  %v3517_v14 = vld [vmem:[#allocation5 + $0x240] ss:$16 sps:$4 sm:$0xff]  }
  0x64   :  { %1310 = vmatpush1.bf16.msra.mxu0 %v3449_v26  ;;  %1474 = vmatpush1.bf16.msra.mxu1 %v3450_v27  ;;  %v3520_v15 = vld [vmem:[#allocation5 + $0x248] ss:$16 sps:$4 sm:$0xff]   ;;  %v3525_v16 = vld [vmem:[#allocation5 + $0x264] ss:$16 sps:$4 sm:$0xff]   ;;  %v3528_v17 = vld [vmem:[#allocation5 + $0x26c] ss:$16 sps:$4 sm:$0xff]  }
  0x65   :  { %1311 = vmatprep.subr.bf16.mxu0 %v3451_v28  ;;  %1475 = vmatprep.subr.bf16.mxu1 %v3453_v29  ;;  %v3523_v18 = vld [vmem:[#allocation5 + $0x260] ss:$16 sps:$4 sm:$0xff]   ;;  %v3526_v19 = vld [vmem:[#allocation5 + $0x268] ss:$16 sps:$4 sm:$0xff]   ;;  %v3531_v20 = vld [vmem:[#allocation5 + $0x284] ss:$16 sps:$4 sm:$0xff]  }
  0x66   :  { %v3534_v21 = vld [vmem:[#allocation5 + $0x28c] ss:$16 sps:$4 sm:$0xff]   ;;  %v3529_v22 = vld [vmem:[#allocation5 + $0x280] ss:$16 sps:$4 sm:$0xff]   ;;  %v3532_v23 = vld [vmem:[#allocation5 + $0x288] ss:$16 sps:$4 sm:$0xff]  }
  0x67   :  { %v3537_v24 = vld [vmem:[#allocation5 + $0x2a4] ss:$16 sps:$4 sm:$0xff]   ;;  %v3540_v25 = vld [vmem:[#allocation5 + $0x2ac] ss:$16 sps:$4 sm:$0xff]   ;;  %v3535_v26 = vld [vmem:[#allocation5 + $0x2a0] ss:$16 sps:$4 sm:$0xff]  }
  0x68   :  { %1312 = vmatpush1.bf16.msra.mxu0 %v3455_v30  ;;  %1476 = vmatpush1.bf16.msra.mxu1 %v3456_v31  ;;  %v3538_v27 = vld [vmem:[#allocation5 + $0x2a8] ss:$16 sps:$4 sm:$0xff]   ;;  %v3543_v28 = vld [vmem:[#allocation5 + $0x2c4] ss:$16 sps:$4 sm:$0xff]   ;;  %v3546_v29 = vld [vmem:[#allocation5 + $0x2cc] ss:$16 sps:$4 sm:$0xff]  }
  0x69   :  { %1313 = vmatprep.subr.bf16.mxu0 %v3457_v32  ;;  %1477 = vmatprep.subr.bf16.mxu1 %v3459_v33  ;;  %v84_v30 = vld [vmem:[#allocation2 + $0x18] sm:$0xff]  ;;  %v3544_v33 = vld [vmem:[#allocation5 + $0x2c8] ss:$16 sps:$4 sm:$0xff]   ;;  %s2945_s30 = sshll.u32 %s4054_s29, 4  ;;  %s2946_s30 = int_to_ptr.vmem [resolvable:$true] %s2945_s30 }
  0x6a   :  { %v3541_v31 = vld [vmem:[#allocation5 + $0x2c0] ss:$16 sps:$4 sm:$0xff]   ;;  %v91_v32 = vpack.c.bf16 %v84_v30, %v84_v30  ;;  %v3567_v46 = vld [vmem:[#allocation5 + $0x344] ss:$16 sps:$4 sm:$0xff]   ;;  %s4015_s8 = scalar_lea.vmem %s2946_s30, 128  ;;  %p4020_p5 = scmp.lt.s32.totalorder %s2946_s30, %s2946_s30 }
  0x6b   :  { %v3565_v48 = vld [vmem:[#allocation5 + $0x340] ss:$16 sps:$4 sm:$0xff]   ;;  %v3597_v2 = vld [vmem:[#allocation5 + $0x3e4] ss:$16 sps:$4 sm:$0xff]   ;;  %p4016_p4 = scmp.ne.s32.totalorder %s2946_s30, %s4015_s8  ;;  %p4021_p6 = scmp.lt.s32.totalorder %s4015_s8, %s4015_s8 }
  0x6c   :  { %1314 = vmatpush1.bf16.msra.mxu0 %v3461_v34  ;;  %1478 = vmatpush1.bf16.msra.mxu1 %v3462_v35  ;;  %v3549_v34 = vld [vmem:[#allocation5 + $0x2e4] ss:$16 sps:$4 sm:$0xff]   ;;  %v3552_v35 = vld [vmem:[#allocation5 + $0x2ec] ss:$16 sps:$4 sm:$0xff]  }
  0x6d   :  { %1315 = vmatprep.subr.bf16.mxu0 %v3463_v36  ;;  %1479 = vmatprep.subr.bf16.mxu1 %v3465_v37  ;;  %v3547_v36 = vld [vmem:[#allocation5 + $0x2e0] ss:$16 sps:$4 sm:$0xff]   ;;  %v3550_v37 = vld [vmem:[#allocation5 + $0x2e8] ss:$16 sps:$4 sm:$0xff]   ;;  %v3633_v30 = vld [vmem:[#allocation5 + $0x4a4] ss:$16 sps:$4 sm:$0xff]   ;;  %p4022_p7 = por %p4021_p6, %p4020_p5 }
  0x6f   :  { %p4023_p8 = pnand %p4022_p7, %p4016_p4 }
  0x70   :  { %1316 = vmatpush1.bf16.msra.mxu0 %v3467_v38  ;;  %1480 = vmatpush1.bf16.msra.mxu1 %v3468_v39  ;;  %v3555_v38 = vld [vmem:[#allocation5 + $0x304] ss:$16 sps:$4 sm:$0xff]   ;;  %v3558_v39 = vld [vmem:[#allocation5 + $0x30c] ss:$16 sps:$4 sm:$0xff]  }
  0x71   :  { %1317 = vmatprep.subr.bf16.mxu0 %v3469_v40  ;;  %1481 = vmatprep.subr.bf16.mxu1 %v3471_v41  ;;  %v3553_v40 = vld [vmem:[#allocation5 + $0x300] ss:$16 sps:$4 sm:$0xff]   ;;  %v3556_v41 = vld [vmem:[#allocation5 + $0x308] ss:$16 sps:$4 sm:$0xff]  }
  0x74   :  { %1318 = vmatpush1.bf16.msra.mxu0 %v3473_v42  ;;  %1482 = vmatpush1.bf16.msra.mxu1 %v3474_v43  ;;  %v3561_v42 = vld [vmem:[#allocation5 + $0x324] ss:$16 sps:$4 sm:$0xff]   ;;  %v3564_v43 = vld [vmem:[#allocation5 + $0x32c] ss:$16 sps:$4 sm:$0xff]  }
  0x75   :  { %1319 = vmatprep.subr.bf16.mxu0 %v3475_v44  ;;  %1483 = vmatprep.subr.bf16.mxu1 %v3477_v45  ;;  %v3559_v44 = vld [vmem:[#allocation5 + $0x320] ss:$16 sps:$4 sm:$0xff]   ;;  %v3562_v45 = vld [vmem:[#allocation5 + $0x328] ss:$16 sps:$4 sm:$0xff]  }
  0x78   :  { %1320 = vmatpush1.bf16.msra.mxu0 %v3479_v47  ;;  %1484 = vmatpush1.bf16.msra.mxu1 %v3480_v49  ;;  %v3570_v47 = vld [vmem:[#allocation5 + $0x34c] ss:$16 sps:$4 sm:$0xff]   ;;  %v3568_v49 = vld [vmem:[#allocation5 + $0x348] ss:$16 sps:$4 sm:$0xff]  }
  0x79   :  { %1321 = vmatprep.subr.bf16.mxu0 %v3481_v50  ;;  %1485 = vmatprep.subr.bf16.mxu1 %v3483_v51  ;;  %v3573_v50 = vld [vmem:[#allocation5 + $0x364] ss:$16 sps:$4 sm:$0xff]   ;;  %v3576_v51 = vld [vmem:[#allocation5 + $0x36c] ss:$16 sps:$4 sm:$0xff]  }
  0x7c   :  { %1322 = vmatpush1.bf16.msra.mxu0 %v3485_v52  ;;  %1486 = vmatpush1.bf16.msra.mxu1 %v3486_v53  ;;  %v3571_v52 = vld [vmem:[#allocation5 + $0x360] ss:$16 sps:$4 sm:$0xff]   ;;  %v3574_v53 = vld [vmem:[#allocation5 + $0x368] ss:$16 sps:$4 sm:$0xff]  }
  0x7d   :  { %1323 = vmatprep.subr.bf16.mxu0 %v3487_v54  ;;  %1487 = vmatprep.subr.bf16.mxu1 %v3489_v55  ;;  %v3579_v54 = vld [vmem:[#allocation5 + $0x384] ss:$16 sps:$4 sm:$0xff]   ;;  %v3582_v55 = vld [vmem:[#allocation5 + $0x38c] ss:$16 sps:$4 sm:$0xff]  }
  0x80   :  { %1324 = vmatpush1.bf16.msra.mxu0 %v3491_v56  ;;  %1488 = vmatpush1.bf16.msra.mxu1 %v3492_v57  ;;  %v3577_v56 = vld [vmem:[#allocation5 + $0x380] ss:$16 sps:$4 sm:$0xff]   ;;  %v3580_v57 = vld [vmem:[#allocation5 + $0x388] ss:$16 sps:$4 sm:$0xff]  }
  0x81   :  { %1325 = vmatprep.subr.bf16.mxu0 %v3493_v58  ;;  %1489 = vmatprep.subr.bf16.mxu1 %v3495_v59  ;;  %v3585_v58 = vld [vmem:[#allocation5 + $0x3a4] ss:$16 sps:$4 sm:$0xff]   ;;  %v3588_v59 = vld [vmem:[#allocation5 + $0x3ac] ss:$16 sps:$4 sm:$0xff]  }
  0x84   :  { %1326 = vmatpush1.bf16.msra.mxu0 %v3497_v60  ;;  %1490 = vmatpush1.bf16.msra.mxu1 %v3498_v61  ;;  %v3583_v60 = vld [vmem:[#allocation5 + $0x3a0] ss:$16 sps:$4 sm:$0xff]   ;;  %v3586_v61 = vld [vmem:[#allocation5 + $0x3a8] ss:$16 sps:$4 sm:$0xff]  }
  0x85   :  { %1327 = vmatprep.subr.bf16.mxu0 %v3499_v62  ;;  %1491 = vmatprep.subr.bf16.mxu1 %v3501_v63  ;;  %v3591_v62 = vld [vmem:[#allocation5 + $0x3c4] ss:$16 sps:$4 sm:$0xff]   ;;  %v3594_v63 = vld [vmem:[#allocation5 + $0x3cc] ss:$16 sps:$4 sm:$0xff]  }
  0x88   :  { %1328 = vmatpush1.bf16.msra.mxu0 %v3503_v0  ;;  %1492 = vmatpush1.bf16.msra.mxu1 %v3504_v1  ;;  %v3589_v0 = vld [vmem:[#allocation5 + $0x3c0] ss:$16 sps:$4 sm:$0xff]   ;;  %v3592_v1 = vld [vmem:[#allocation5 + $0x3c8] ss:$16 sps:$4 sm:$0xff]  }
  0x89   :  { %1338 = vmatprep.subr.bf16.mxu0 %v3507_v3  ;;  %1502 = vmatprep.subr.bf16.mxu1 %v3510_v4  ;;  %v3600_v3 = vld [vmem:[#allocation5 + $0x3ec] ss:$16 sps:$4 sm:$0xff]   ;;  %v3595_v4 = vld [vmem:[#allocation5 + $0x3e0] ss:$16 sps:$4 sm:$0xff]  }
  0x8b   :  { %1330 = vmatmul.mubr.bf16.vlgmr.msra.gmra.mrb[0].mxu0 %v88_v5  ;;  %1494 = vmatmul.mubr.bf16.vlgmr.msra.gmra.mrb[0].mxu1 %v88_v5  ;;  %v3598_v5 = vld [vmem:[#allocation5 + $0x3e8] ss:$16 sps:$4 sm:$0xff]  }
  0x8c   :  { %1339 = vmatpush1.bf16.msra.mxu0 %v3505_v6  ;;  %1503 = vmatpush1.bf16.msra.mxu1 %v3508_v7  ;;  %v3603_v6 = vld [vmem:[#allocation5 + $0x404] ss:$16 sps:$4 sm:$0xff]   ;;  %v83_v7 = vld [vmem:[#allocation2 + $0x10] sm:$0xff] }
  0x8d   :  { %1340 = vmatprep.subr.bf16.mxu0 %v3513_v8  ;;  %1504 = vmatprep.subr.bf16.mxu1 %v3516_v9  ;;  %v3606_v8 = vld [vmem:[#allocation5 + $0x40c] ss:$16 sps:$4 sm:$0xff]   ;;  %v3601_v9 = vld [vmem:[#allocation5 + $0x400] ss:$16 sps:$4 sm:$0xff]  }
  0x8e   :  { %1370 = vmatprep.mubr.bf16.mxu0 %v91_v32  ;;  %1534 = vmatprep.mubr.bf16.mxu1 %v91_v32  ;;  %v3631_v32 = vld [vmem:[#allocation5 + $0x4a0] ss:$16 sps:$4 sm:$0xff]  }
  0x90   :  { %1341 = vmatpush1.bf16.msra.mxu0 %v3511_v10  ;;  %1505 = vmatpush1.bf16.msra.mxu1 %v3514_v11  ;;  %v90_v10 = vpack.c.bf16 %v83_v7, %v83_v7  ;;  %v3604_v11 = vld [vmem:[#allocation5 + $0x408] ss:$16 sps:$4 sm:$0xff]   ;;  %v3696_v7 = vld [vmem:[#allocation5 + $0x5ec] ss:$16 sps:$4 sm:$0xff]  }
  0x91   :  { %1342 = vmatprep.subr.bf16.mxu0 %v3519_v12  ;;  %1506 = vmatprep.subr.bf16.mxu1 %v3522_v13  ;;  %v3609_v12 = vld [vmem:[#allocation5 + $0x424] ss:$16 sps:$4 sm:$0xff]   ;;  %v3612_v13 = vld [vmem:[#allocation5 + $0x42c] ss:$16 sps:$4 sm:$0xff]  }
  0x94   :  { %1343 = vmatpush1.bf16.msra.mxu0 %v3517_v14  ;;  %1507 = vmatpush1.bf16.msra.mxu1 %v3520_v15  ;;  %v86_v14 = vld [vmem:[#allocation2 + $0x28] sm:$0xff] }
  0x95   :  { %1344 = vmatprep.subr.bf16.mxu0 %v3525_v16  ;;  %1508 = vmatprep.subr.bf16.mxu1 %v3528_v17  ;;  %v93_v15 = vpack.c.bf16 %v86_v14, %v86_v14  ;;  %v3607_v16 = vld [vmem:[#allocation5 + $0x420] ss:$16 sps:$4 sm:$0xff]   ;;  %v3610_v17 = vld [vmem:[#allocation5 + $0x428] ss:$16 sps:$4 sm:$0xff]  }
  0x96   :  { %v3700_v14 = vld [vmem:[#allocation5 + $0x608] ss:$16 sps:$4 sm:$0xff]  }
  0x98   :  { %1345 = vmatpush1.bf16.msra.mxu0 %v3523_v18  ;;  %1509 = vmatpush1.bf16.msra.mxu1 %v3526_v19  ;;  %v3615_v18 = vld [vmem:[#allocation5 + $0x444] ss:$16 sps:$4 sm:$0xff]   ;;  %v3618_v19 = vld [vmem:[#allocation5 + $0x44c] ss:$16 sps:$4 sm:$0xff]  }
  0x99   :  { %1346 = vmatprep.subr.bf16.mxu0 %v3531_v20  ;;  %1510 = vmatprep.subr.bf16.mxu1 %v3534_v21  ;;  %v3613_v20 = vld [vmem:[#allocation5 + $0x440] ss:$16 sps:$4 sm:$0xff]   ;;  %v3616_v21 = vld [vmem:[#allocation5 + $0x448] ss:$16 sps:$4 sm:$0xff]  }
  0x9c   :  { %1347 = vmatpush1.bf16.msra.mxu0 %v3529_v22  ;;  %1511 = vmatpush1.bf16.msra.mxu1 %v3532_v23  ;;  %v3621_v22 = vld [vmem:[#allocation5 + $0x464] ss:$16 sps:$4 sm:$0xff]   ;;  %v3624_v23 = vld [vmem:[#allocation5 + $0x46c] ss:$16 sps:$4 sm:$0xff]  }
  0x9d   :  { %1348 = vmatprep.subr.bf16.mxu0 %v3537_v24  ;;  %1512 = vmatprep.subr.bf16.mxu1 %v3540_v25  ;;  %v3619_v24 = vld [vmem:[#allocation5 + $0x460] ss:$16 sps:$4 sm:$0xff]   ;;  %v3622_v25 = vld [vmem:[#allocation5 + $0x468] ss:$16 sps:$4 sm:$0xff]  }
  0xa0   :  { %1349 = vmatpush1.bf16.msra.mxu0 %v3535_v26  ;;  %1513 = vmatpush1.bf16.msra.mxu1 %v3538_v27  ;;  %v3627_v26 = vld [vmem:[#allocation5 + $0x484] ss:$16 sps:$4 sm:$0xff]   ;;  %v3630_v27 = vld [vmem:[#allocation5 + $0x48c] ss:$16 sps:$4 sm:$0xff]  }
  0xa1   :  { %1350 = vmatprep.subr.bf16.mxu0 %v3543_v28  ;;  %1514 = vmatprep.subr.bf16.mxu1 %v3546_v29  ;;  %v3625_v28 = vld [vmem:[#allocation5 + $0x480] ss:$16 sps:$4 sm:$0xff]   ;;  %v3628_v29 = vld [vmem:[#allocation5 + $0x488] ss:$16 sps:$4 sm:$0xff]  }
  0xa4   :  { %1351 = vmatpush1.bf16.msra.mxu0 %v3541_v31  ;;  %1515 = vmatpush1.bf16.msra.mxu1 %v3544_v33  ;;  %v3636_v31 = vld [vmem:[#allocation5 + $0x4ac] ss:$16 sps:$4 sm:$0xff]   ;;  %v3634_v33 = vld [vmem:[#allocation5 + $0x4a8] ss:$16 sps:$4 sm:$0xff]  }
  0xa5   :  { %1352 = vmatprep.subr.bf16.mxu0 %v3549_v34  ;;  %1516 = vmatprep.subr.bf16.mxu1 %v3552_v35  ;;  %v3639_v34 = vld [vmem:[#allocation5 + $0x4c4] ss:$16 sps:$4 sm:$0xff]   ;;  %v3642_v35 = vld [vmem:[#allocation5 + $0x4cc] ss:$16 sps:$4 sm:$0xff]  }
  0xa8   :  { %1353 = vmatpush1.bf16.msra.mxu0 %v3547_v36  ;;  %1517 = vmatpush1.bf16.msra.mxu1 %v3550_v37  ;;  %v3637_v36 = vld [vmem:[#allocation5 + $0x4c0] ss:$16 sps:$4 sm:$0xff]   ;;  %v3640_v37 = vld [vmem:[#allocation5 + $0x4c8] ss:$16 sps:$4 sm:$0xff]  }
  0xa9   :  { %1354 = vmatprep.subr.bf16.mxu0 %v3555_v38  ;;  %1518 = vmatprep.subr.bf16.mxu1 %v3558_v39  ;;  %v3645_v38 = vld [vmem:[#allocation5 + $0x4e4] ss:$16 sps:$4 sm:$0xff]   ;;  %v3648_v39 = vld [vmem:[#allocation5 + $0x4ec] ss:$16 sps:$4 sm:$0xff]  }
  0xac   :  { %1355 = vmatpush1.bf16.msra.mxu0 %v3553_v40  ;;  %1519 = vmatpush1.bf16.msra.mxu1 %v3556_v41  ;;  %v3643_v40 = vld [vmem:[#allocation5 + $0x4e0] ss:$16 sps:$4 sm:$0xff]   ;;  %v3646_v41 = vld [vmem:[#allocation5 + $0x4e8] ss:$16 sps:$4 sm:$0xff]  }
  0xad   :  { %1356 = vmatprep.subr.bf16.mxu0 %v3561_v42  ;;  %1520 = vmatprep.subr.bf16.mxu1 %v3564_v43  ;;  %v3651_v42 = vld [vmem:[#allocation5 + $0x504] ss:$16 sps:$4 sm:$0xff]   ;;  %v3654_v43 = vld [vmem:[#allocation5 + $0x50c] ss:$16 sps:$4 sm:$0xff]  }
  0xb0   :  { %1357 = vmatpush1.bf16.msra.mxu0 %v3559_v44  ;;  %1521 = vmatpush1.bf16.msra.mxu1 %v3562_v45  ;;  %v3649_v44 = vld [vmem:[#allocation5 + $0x500] ss:$16 sps:$4 sm:$0xff]   ;;  %v3652_v45 = vld [vmem:[#allocation5 + $0x508] ss:$16 sps:$4 sm:$0xff]  }
  0xb1   :  { %1358 = vmatprep.subr.bf16.mxu0 %v3567_v46  ;;  %1522 = vmatprep.subr.bf16.mxu1 %v3570_v47  ;;  %v3657_v46 = vld [vmem:[#allocation5 + $0x524] ss:$16 sps:$4 sm:$0xff]   ;;  %v3660_v47 = vld [vmem:[#allocation5 + $0x52c] ss:$16 sps:$4 sm:$0xff]  }
  0xb4   :  { %1359 = vmatpush1.bf16.msra.mxu0 %v3565_v48  ;;  %1523 = vmatpush1.bf16.msra.mxu1 %v3568_v49  ;;  %v3655_v48 = vld [vmem:[#allocation5 + $0x520] ss:$16 sps:$4 sm:$0xff]   ;;  %v3658_v49 = vld [vmem:[#allocation5 + $0x528] ss:$16 sps:$4 sm:$0xff]  }
  0xb5   :  { %1360 = vmatprep.subr.bf16.mxu0 %v3573_v50  ;;  %1524 = vmatprep.subr.bf16.mxu1 %v3576_v51  ;;  %v3663_v50 = vld [vmem:[#allocation5 + $0x544] ss:$16 sps:$4 sm:$0xff]   ;;  %v3666_v51 = vld [vmem:[#allocation5 + $0x54c] ss:$16 sps:$4 sm:$0xff]  }
  0xb8   :  { %1361 = vmatpush1.bf16.msra.mxu0 %v3571_v52  ;;  %1525 = vmatpush1.bf16.msra.mxu1 %v3574_v53  ;;  %v3661_v52 = vld [vmem:[#allocation5 + $0x540] ss:$16 sps:$4 sm:$0xff]   ;;  %v3664_v53 = vld [vmem:[#allocation5 + $0x548] ss:$16 sps:$4 sm:$0xff]  }
  0xb9   :  { %1362 = vmatprep.subr.bf16.mxu0 %v3579_v54  ;;  %1526 = vmatprep.subr.bf16.mxu1 %v3582_v55  ;;  %v3669_v54 = vld [vmem:[#allocation5 + $0x564] ss:$16 sps:$4 sm:$0xff]   ;;  %v3672_v55 = vld [vmem:[#allocation5 + $0x56c] ss:$16 sps:$4 sm:$0xff]  }
  0xbc   :  { %1363 = vmatpush1.bf16.msra.mxu0 %v3577_v56  ;;  %1527 = vmatpush1.bf16.msra.mxu1 %v3580_v57  ;;  %v3667_v56 = vld [vmem:[#allocation5 + $0x560] ss:$16 sps:$4 sm:$0xff]   ;;  %v3670_v57 = vld [vmem:[#allocation5 + $0x568] ss:$16 sps:$4 sm:$0xff]  }
  0xbd   :  { %1364 = vmatprep.subr.bf16.mxu0 %v3585_v58  ;;  %1528 = vmatprep.subr.bf16.mxu1 %v3588_v59  ;;  %v3675_v58 = vld [vmem:[#allocation5 + $0x584] ss:$16 sps:$4 sm:$0xff]   ;;  %v3678_v59 = vld [vmem:[#allocation5 + $0x58c] ss:$16 sps:$4 sm:$0xff]  }
  0xc0   :  { %1365 = vmatpush1.bf16.msra.mxu0 %v3583_v60  ;;  %1529 = vmatpush1.bf16.msra.mxu1 %v3586_v61  ;;  %v3673_v60 = vld [vmem:[#allocation5 + $0x580] ss:$16 sps:$4 sm:$0xff]   ;;  %v3676_v61 = vld [vmem:[#allocation5 + $0x588] ss:$16 sps:$4 sm:$0xff]  }
  0xc1   :  { %1366 = vmatprep.subr.bf16.mxu0 %v3591_v62  ;;  %1530 = vmatprep.subr.bf16.mxu1 %v3594_v63  ;;  %v3681_v62 = vld [vmem:[#allocation5 + $0x5a4] ss:$16 sps:$4 sm:$0xff]   ;;  %v3684_v63 = vld [vmem:[#allocation5 + $0x5ac] ss:$16 sps:$4 sm:$0xff]  }
  0xc4   :  { %1367 = vmatpush1.bf16.msra.mxu0 %v3589_v0  ;;  %1531 = vmatpush1.bf16.msra.mxu1 %v3592_v1  ;;  %v3679_v0 = vld [vmem:[#allocation5 + $0x5a0] ss:$16 sps:$4 sm:$0xff]   ;;  %v3682_v1 = vld [vmem:[#allocation5 + $0x5a8] ss:$16 sps:$4 sm:$0xff]  }
  0xc5   :  { %1368 = vmatprep.subr.bf16.mxu0 %v3597_v2  ;;  %1532 = vmatprep.subr.bf16.mxu1 %v3600_v3  ;;  %v3687_v2 = vld [vmem:[#allocation5 + $0x5c4] ss:$16 sps:$4 sm:$0xff]   ;;  %v3690_v3 = vld [vmem:[#allocation5 + $0x5cc] ss:$16 sps:$4 sm:$0xff]  }
  0xc8   :  { %1369 = vmatpush1.bf16.msra.mxu0 %v3595_v4  ;;  %1533 = vmatpush1.bf16.msra.mxu1 %v3598_v5  ;;  %v3685_v4 = vld [vmem:[#allocation5 + $0x5c0] ss:$16 sps:$4 sm:$0xff]   ;;  %v3688_v5 = vld [vmem:[#allocation5 + $0x5c8] ss:$16 sps:$4 sm:$0xff]  }
  0xc9   :  { %1379 = vmatprep.subr.bf16.mxu0 %v3603_v6  ;;  %1543 = vmatprep.subr.bf16.mxu1 %v3606_v8  ;;  %v3693_v6 = vld [vmem:[#allocation5 + $0x5e4] ss:$16 sps:$4 sm:$0xff]   ;;  %v3691_v8 = vld [vmem:[#allocation5 + $0x5e0] ss:$16 sps:$4 sm:$0xff]  }
  0xcb   :  { %1371 = vmatmul.mubr.bf16.vlgmr.msra.gmra.mrb[0].mxu0 %v90_v10  ;;  %1535 = vmatmul.mubr.bf16.vlgmr.msra.gmra.mrb[0].mxu1 %v90_v10  ;;  %v85_v10 = vld [vmem:[#allocation2 + $0x20] sm:$0xff] }
  0xcc   :  { %1380 = vmatpush1.bf16.msra.mxu0 %v3601_v9  ;;  %1544 = vmatpush1.bf16.msra.mxu1 %v3604_v11  ;;  %v3694_v9 = vld [vmem:[#allocation5 + $0x5e8] ss:$16 sps:$4 sm:$0xff]   ;;  %v3699_v11 = vld [vmem:[#allocation5 + $0x604] ss:$16 sps:$4 sm:$0xff]  }
  0xcd   :  { %1381 = vmatprep.subr.bf16.mxu0 %v3609_v12  ;;  %1545 = vmatprep.subr.bf16.mxu1 %v3612_v13  ;;  %v3702_v12 = vld [vmem:[#allocation5 + $0x60c] ss:$16 sps:$4 sm:$0xff]   ;;  %v3697_v13 = vld [vmem:[#allocation5 + $0x600] ss:$16 sps:$4 sm:$0xff]  }
  0xce   :  { %1411 = vmatprep.mubr.bf16.mxu0 %v93_v15  ;;  %1575 = vmatprep.mubr.bf16.mxu1 %v93_v15  ;;  %v92_v15 = vpack.c.bf16 %v85_v10, %v85_v10  ;;  %v3784_v10 = vld [vmem:[#allocation7 + $0x1a8] ss:$16 sps:$4 sm:$0xff]  }
  0xd0   :  { %1382 = vmatpush1.bf16.msra.mxu0 %v3607_v16  ;;  %1546 = vmatpush1.bf16.msra.mxu1 %v3610_v17  ;;  %v3705_v16 = vld [vmem:[#allocation7 + $0x4] ss:$16 sps:$4 sm:$0xff]   ;;  %v3708_v17 = vld [vmem:[#allocation7 + $0xc] ss:$16 sps:$4 sm:$0xff]  }
  0xd1   :  { %1383 = vmatprep.subr.bf16.mxu0 %v3615_v18  ;;  %1547 = vmatprep.subr.bf16.mxu1 %v3618_v19  ;;  %v4053_v18 = vmov 0   ;;  %v87_v19 = vld [vmem:[#allocation2 + $0x30] sm:$0xff] }
  0xd4   :  { %1384 = vmatpush1.bf16.msra.mxu0 %v3613_v20  ;;  %1548 = vmatpush1.bf16.msra.mxu1 %v3616_v21  ;;  %v3703_v20 = vld [vmem:[#allocation7] ss:$16 sps:$4 sm:$0xff]   ;;  %v3706_v21 = vld [vmem:[#allocation7 + $0x8] ss:$16 sps:$4 sm:$0xff]  }
  0xd5   :  { %1385 = vmatprep.subr.bf16.mxu0 %v3621_v22  ;;  %1549 = vmatprep.subr.bf16.mxu1 %v3624_v23  ;;  %v94_v22 = vpack.c.bf16 %v87_v19, %v87_v19  ;;  %v3711_v23 = vld [vmem:[#allocation7 + $0x24] ss:$16 sps:$4 sm:$0xff]  }
  0xd6   :  { %v3801_v19 = vld [vmem:[#allocation7 + $0x204] ss:$16 sps:$4 sm:$0xff]  }
  0xd8   :  { %1386 = vmatpush1.bf16.msra.mxu0 %v3619_v24  ;;  %1550 = vmatpush1.bf16.msra.mxu1 %v3622_v25  ;;  %v3714_v24 = vld [vmem:[#allocation7 + $0x2c] ss:$16 sps:$4 sm:$0xff]   ;;  %v3709_v25 = vld [vmem:[#allocation7 + $0x20] ss:$16 sps:$4 sm:$0xff]  }
  0xd9   :  { %1387 = vmatprep.subr.bf16.mxu0 %v3627_v26  ;;  %1551 = vmatprep.subr.bf16.mxu1 %v3630_v27  ;;  %v3712_v26 = vld [vmem:[#allocation7 + $0x28] ss:$16 sps:$4 sm:$0xff]   ;;  %v3717_v27 = vld [vmem:[#allocation7 + $0x44] ss:$16 sps:$4 sm:$0xff]  }
  0xdc   :  { %1388 = vmatpush1.bf16.msra.mxu0 %v3625_v28  ;;  %1552 = vmatpush1.bf16.msra.mxu1 %v3628_v29  ;;  %v3720_v28 = vld [vmem:[#allocation7 + $0x4c] ss:$16 sps:$4 sm:$0xff]   ;;  %v3715_v29 = vld [vmem:[#allocation7 + $0x40] ss:$16 sps:$4 sm:$0xff]  }
  0xdd   :  { %1389 = vmatprep.subr.bf16.mxu0 %v3633_v30  ;;  %1553 = vmatprep.subr.bf16.mxu1 %v3636_v31  ;;  %v3718_v30 = vld [vmem:[#allocation7 + $0x48] ss:$16 sps:$4 sm:$0xff]   ;;  %v3723_v31 = vld [vmem:[#allocation7 + $0x64] ss:$16 sps:$4 sm:$0xff]  }
  0xe0   :  { %1390 = vmatpush1.bf16.msra.mxu0 %v3631_v32  ;;  %1554 = vmatpush1.bf16.msra.mxu1 %v3634_v33  ;;  %v3726_v32 = vld [vmem:[#allocation7 + $0x6c] ss:$16 sps:$4 sm:$0xff]   ;;  %v3721_v33 = vld [vmem:[#allocation7 + $0x60] ss:$16 sps:$4 sm:$0xff]  }
  0xe1   :  { %1391 = vmatprep.subr.bf16.mxu0 %v3639_v34  ;;  %1555 = vmatprep.subr.bf16.mxu1 %v3642_v35  ;;  %v3724_v34 = vld [vmem:[#allocation7 + $0x68] ss:$16 sps:$4 sm:$0xff]   ;;  %v3729_v35 = vld [vmem:[#allocation7 + $0x84] ss:$16 sps:$4 sm:$0xff]  }
  0xe4   :  { %1392 = vmatpush1.bf16.msra.mxu0 %v3637_v36  ;;  %1556 = vmatpush1.bf16.msra.mxu1 %v3640_v37  ;;  %v3732_v36 = vld [vmem:[#allocation7 + $0x8c] ss:$16 sps:$4 sm:$0xff]   ;;  %v3727_v37 = vld [vmem:[#allocation7 + $0x80] ss:$16 sps:$4 sm:$0xff]  }
  0xe5   :  { %1393 = vmatprep.subr.bf16.mxu0 %v3645_v38  ;;  %1557 = vmatprep.subr.bf16.mxu1 %v3648_v39  ;;  %v3730_v38 = vld [vmem:[#allocation7 + $0x88] ss:$16 sps:$4 sm:$0xff]   ;;  %v3735_v39 = vld [vmem:[#allocation7 + $0xa4] ss:$16 sps:$4 sm:$0xff]  }
  0xe8   :  { %1394 = vmatpush1.bf16.msra.mxu0 %v3643_v40  ;;  %1558 = vmatpush1.bf16.msra.mxu1 %v3646_v41  ;;  %v3738_v40 = vld [vmem:[#allocation7 + $0xac] ss:$16 sps:$4 sm:$0xff]   ;;  %v3733_v41 = vld [vmem:[#allocation7 + $0xa0] ss:$16 sps:$4 sm:$0xff]  }
  0xe9   :  { %1395 = vmatprep.subr.bf16.mxu0 %v3651_v42  ;;  %1559 = vmatprep.subr.bf16.mxu1 %v3654_v43  ;;  %v3736_v42 = vld [vmem:[#allocation7 + $0xa8] ss:$16 sps:$4 sm:$0xff]   ;;  %v3741_v43 = vld [vmem:[#allocation7 + $0xc4] ss:$16 sps:$4 sm:$0xff]  }
  0xec   :  { %1396 = vmatpush1.bf16.msra.mxu0 %v3649_v44  ;;  %1560 = vmatpush1.bf16.msra.mxu1 %v3652_v45  ;;  %v3744_v44 = vld [vmem:[#allocation7 + $0xcc] ss:$16 sps:$4 sm:$0xff]   ;;  %v3739_v45 = vld [vmem:[#allocation7 + $0xc0] ss:$16 sps:$4 sm:$0xff]  }
  0xed   :  { %1397 = vmatprep.subr.bf16.mxu0 %v3657_v46  ;;  %1561 = vmatprep.subr.bf16.mxu1 %v3660_v47  ;;  %v3742_v46 = vld [vmem:[#allocation7 + $0xc8] ss:$16 sps:$4 sm:$0xff]   ;;  %v3747_v47 = vld [vmem:[#allocation7 + $0xe4] ss:$16 sps:$4 sm:$0xff]  }
  0xf0   :  { %1398 = vmatpush1.bf16.msra.mxu0 %v3655_v48  ;;  %1562 = vmatpush1.bf16.msra.mxu1 %v3658_v49  ;;  %v3750_v48 = vld [vmem:[#allocation7 + $0xec] ss:$16 sps:$4 sm:$0xff]   ;;  %v3745_v49 = vld [vmem:[#allocation7 + $0xe0] ss:$16 sps:$4 sm:$0xff]  }
  0xf1   :  { %1399 = vmatprep.subr.bf16.mxu0 %v3663_v50  ;;  %1563 = vmatprep.subr.bf16.mxu1 %v3666_v51  ;;  %v3748_v50 = vld [vmem:[#allocation7 + $0xe8] ss:$16 sps:$4 sm:$0xff]   ;;  %v3753_v51 = vld [vmem:[#allocation7 + $0x104] ss:$16 sps:$4 sm:$0xff]  }
  0xf4   :  { %1400 = vmatpush1.bf16.msra.mxu0 %v3661_v52  ;;  %1564 = vmatpush1.bf16.msra.mxu1 %v3664_v53  ;;  %v3756_v52 = vld [vmem:[#allocation7 + $0x10c] ss:$16 sps:$4 sm:$0xff]   ;;  %v3751_v53 = vld [vmem:[#allocation7 + $0x100] ss:$16 sps:$4 sm:$0xff]  }
  0xf5   :  { %1401 = vmatprep.subr.bf16.mxu0 %v3669_v54  ;;  %1565 = vmatprep.subr.bf16.mxu1 %v3672_v55  ;;  %v3754_v54 = vld [vmem:[#allocation7 + $0x108] ss:$16 sps:$4 sm:$0xff]   ;;  %v3759_v55 = vld [vmem:[#allocation7 + $0x124] ss:$16 sps:$4 sm:$0xff]  }
  0xf8   :  { %1402 = vmatpush1.bf16.msra.mxu0 %v3667_v56  ;;  %1566 = vmatpush1.bf16.msra.mxu1 %v3670_v57  ;;  %v3762_v56 = vld [vmem:[#allocation7 + $0x12c] ss:$16 sps:$4 sm:$0xff]   ;;  %v3757_v57 = vld [vmem:[#allocation7 + $0x120] ss:$16 sps:$4 sm:$0xff]  }
  0xf9   :  { %1403 = vmatprep.subr.bf16.mxu0 %v3675_v58  ;;  %1567 = vmatprep.subr.bf16.mxu1 %v3678_v59  ;;  %v3760_v58 = vld [vmem:[#allocation7 + $0x128] ss:$16 sps:$4 sm:$0xff]   ;;  %v3765_v59 = vld [vmem:[#allocation7 + $0x144] ss:$16 sps:$4 sm:$0xff]  }
  0xfc   :  { %1404 = vmatpush1.bf16.msra.mxu0 %v3673_v60  ;;  %1568 = vmatpush1.bf16.msra.mxu1 %v3676_v61  ;;  %v3768_v60 = vld [vmem:[#allocation7 + $0x14c] ss:$16 sps:$4 sm:$0xff]   ;;  %v3763_v61 = vld [vmem:[#allocation7 + $0x140] ss:$16 sps:$4 sm:$0xff]  }
  0xfd   :  { %1405 = vmatprep.subr.bf16.mxu0 %v3681_v62  ;;  %1569 = vmatprep.subr.bf16.mxu1 %v3684_v63  ;;  %v3766_v62 = vld [vmem:[#allocation7 + $0x148] ss:$16 sps:$4 sm:$0xff]   ;;  %v3771_v63 = vld [vmem:[#allocation7 + $0x164] ss:$16 sps:$4 sm:$0xff]  }
 0x100   :  { %1406 = vmatpush1.bf16.msra.mxu0 %v3679_v0  ;;  %1570 = vmatpush1.bf16.msra.mxu1 %v3682_v1  ;;  %v3774_v0 = vld [vmem:[#allocation7 + $0x16c] ss:$16 sps:$4 sm:$0xff]   ;;  %v3769_v1 = vld [vmem:[#allocation7 + $0x160] ss:$16 sps:$4 sm:$0xff]  }
 0x101   :  { %1407 = vmatprep.subr.bf16.mxu0 %v3687_v2  ;;  %1571 = vmatprep.subr.bf16.mxu1 %v3690_v3  ;;  %v3772_v2 = vld [vmem:[#allocation7 + $0x168] ss:$16 sps:$4 sm:$0xff]   ;;  %v3777_v3 = vld [vmem:[#allocation7 + $0x184] ss:$16 sps:$4 sm:$0xff]  }
 0x104   :  { %1408 = vmatpush1.bf16.msra.mxu0 %v3685_v4  ;;  %1572 = vmatpush1.bf16.msra.mxu1 %v3688_v5  ;;  %v3780_v4 = vld [vmem:[#allocation7 + $0x18c] ss:$16 sps:$4 sm:$0xff]   ;;  %v3775_v5 = vld [vmem:[#allocation7 + $0x180] ss:$16 sps:$4 sm:$0xff]  }
 0x105   :  { %1409 = vmatprep.subr.bf16.mxu0 %v3693_v6  ;;  %1573 = vmatprep.subr.bf16.mxu1 %v3696_v7  ;;  %v3778_v6 = vld [vmem:[#allocation7 + $0x188] ss:$16 sps:$4 sm:$0xff]   ;;  %v3783_v7 = vld [vmem:[#allocation7 + $0x1a4] ss:$16 sps:$4 sm:$0xff]  }
 0x108   :  { %1410 = vmatpush1.bf16.msra.mxu0 %v3691_v8  ;;  %1574 = vmatpush1.bf16.msra.mxu1 %v3694_v9  ;;  %v3786_v8 = vld [vmem:[#allocation7 + $0x1ac] ss:$16 sps:$4 sm:$0xff]   ;;  %v3781_v9 = vld [vmem:[#allocation7 + $0x1a0] ss:$16 sps:$4 sm:$0xff]  }
 0x109   :  { %1420 = vmatprep.subr.bf16.mxu0 %v3699_v11  ;;  %1584 = vmatprep.subr.bf16.mxu1 %v3702_v12  ;;  %v3789_v11 = vld [vmem:[#allocation7 + $0x1c4] ss:$16 sps:$4 sm:$0xff]   ;;  %v3792_v12 = vld [vmem:[#allocation7 + $0x1cc] ss:$16 sps:$4 sm:$0xff]  }
 0x10b   :  { %1412 = vmatmul.mubr.bf16.vlgmr.msra.gmra.mrb[0].mxu0 %v92_v15  ;;  %1576 = vmatmul.mubr.bf16.vlgmr.msra.gmra.mrb[0].mxu1 %v92_v15  ;;  %v3795_v15 = vld [vmem:[#allocation7 + $0x1e4] ss:$16 sps:$4 sm:$0xff]  }
 0x10c   :  { %1421 = vmatpush1.bf16.msra.mxu0 %v3697_v13  ;;  %1585 = vmatpush1.bf16.msra.mxu1 %v3700_v14  ;;  %v3787_v13 = vld [vmem:[#allocation7 + $0x1c0] ss:$16 sps:$4 sm:$0xff]   ;;  %v3790_v14 = vld [vmem:[#allocation7 + $0x1c8] ss:$16 sps:$4 sm:$0xff]  }
 0x10d   :  { %1452 = vmatprep.mubr.bf16.mxu0 %v4053_v18  ;;  %1616 = vmatprep.mubr.bf16.mxu1 %v4053_v18  ;;  %v3796_v18 = vld [vmem:[#allocation7 + $0x1e8] ss:$16 sps:$4 sm:$0xff]  }
 0x10e   :  { %2423 = vmatprep.subr.bf16.mxu0 %v3705_v16  ;;  %2505 = vmatprep.subr.bf16.mxu1 %v3708_v17  ;;  %v3798_v16 = vld [vmem:[#allocation7 + $0x1ec] ss:$16 sps:$4 sm:$0xff]   ;;  %v3793_v17 = vld [vmem:[#allocation7 + $0x1e0] ss:$16 sps:$4 sm:$0xff]  }
 0x117   :  { %3152 = vmatmul.mubr.msk.bf16.vlgmr.msra.gmra.mrb[0].mxu0 %vm1293_vm0, %v94_v22  ;;  %3153 = vmatmul.mubr.msk.bf16.vlgmr.msra.gmra.mrb[0].mxu1 %vm1293_vm0, %v94_v22 }
 0x118   :  { %2424 = vmatpush1.bf16.msra.mxu0 %v3703_v20  ;;  %2506 = vmatpush1.bf16.msra.mxu1 %v3706_v21  ;;  %v3804_v20 = vld [vmem:[#allocation7 + $0x20c] ss:$16 sps:$4 sm:$0xff]   ;;  %v293_v21 = vlaneseq }
 0x119   :  { %2425 = vmatprep.subr.bf16.mxu0 %v3711_v23  ;;  %2507 = vmatprep.subr.bf16.mxu1 %v3714_v24  ;;  %v4155_v24 = vld [vmem:[%s4203_s2] sm:$0xf] }
 0x11a   :  { %v4149_v22 = vshrl.u32 %v293_v21, 7  ;;  %v3861_v21 = vld [vmem:[#allocation7 + $0x344] ss:$16 sps:$4 sm:$0xff]  }
 0x11c   :  { %2426 = vmatpush1.bf16.msra.mxu0 %v3709_v25  ;;  %2508 = vmatpush1.bf16.msra.mxu1 %v3712_v26  ;;  %v295_v23 = vsub.s32 0, %v4149_v22  ;;  %v299_v25 = vsub.s32 1, %v4149_v22  ;;  %v307_v26 = vsub.s32 3, %v4149_v22 }
 0x11d   :  { %2427 = vmatprep.subr.bf16.mxu0 %v3717_v27  ;;  %2509 = vmatprep.subr.bf16.mxu1 %v3720_v28 }
 0x11e   :  { %v296_v27 = vrot.slane %v4155_v24, %v295_v23  ;;  %v300_v28 = vrot.slane %v4155_v24, %v299_v25 }
 0x120   :  { %2428 = vmatpush1.bf16.msra.mxu0 %v3715_v29  ;;  %2510 = vmatpush1.bf16.msra.mxu1 %v3718_v30  ;;  %v308_v29 = vrot.slane %v4155_v24, %v307_v26 }
 0x121   :  { %2429 = vmatprep.subr.bf16.mxu0 %v3723_v31  ;;  %2511 = vmatprep.subr.bf16.mxu1 %v3726_v32 }
 0x124   :  { %2430 = vmatpush1.bf16.msra.mxu0 %v3721_v33  ;;  %2512 = vmatpush1.bf16.msra.mxu1 %v3724_v34 }
 0x125   :  { %2431 = vmatprep.subr.bf16.mxu0 %v3729_v35  ;;  %2513 = vmatprep.subr.bf16.mxu1 %v3732_v36 }
 0x128   :  { %2432 = vmatpush1.bf16.msra.mxu0 %v3727_v37  ;;  %2514 = vmatpush1.bf16.msra.mxu1 %v3730_v38 }
 0x129   :  { %2433 = vmatprep.subr.bf16.mxu0 %v3735_v39  ;;  %2515 = vmatprep.subr.bf16.mxu1 %v3738_v40 }
 0x12c   :  { %2434 = vmatpush1.bf16.msra.mxu0 %v3733_v41  ;;  %2516 = vmatpush1.bf16.msra.mxu1 %v3736_v42 }
 0x12d   :  { %2435 = vmatprep.subr.bf16.mxu0 %v3741_v43  ;;  %2517 = vmatprep.subr.bf16.mxu1 %v3744_v44 }
 0x130   :  { %2436 = vmatpush1.bf16.msra.mxu0 %v3739_v45  ;;  %2518 = vmatpush1.bf16.msra.mxu1 %v3742_v46  ;;  %v3799_v45 = vld [vmem:[#allocation7 + $0x200] ss:$16 sps:$4 sm:$0xff]   ;;  %v3802_v46 = vld [vmem:[#allocation7 + $0x208] ss:$16 sps:$4 sm:$0xff]  }
 0x131   :  { %2437 = vmatprep.subr.bf16.mxu0 %v3747_v47  ;;  %2519 = vmatprep.subr.bf16.mxu1 %v3750_v48  ;;  %v3807_v48 = vld [vmem:[#allocation7 + $0x224] ss:$16 sps:$4 sm:$0xff]  }
 0x134   :  { %2438 = vmatpush1.bf16.msra.mxu0 %v3745_v49  ;;  %2520 = vmatpush1.bf16.msra.mxu1 %v3748_v50  ;;  %v3810_v49 = vld [vmem:[#allocation7 + $0x22c] ss:$16 sps:$4 sm:$0xff]  }
 0x135   :  { %2439 = vmatprep.subr.bf16.mxu0 %v3753_v51  ;;  %2521 = vmatprep.subr.bf16.mxu1 %v3756_v52  ;;  %v3805_v51 = vld [vmem:[#allocation7 + $0x220] ss:$16 sps:$4 sm:$0xff]   ;;  %v3808_v52 = vld [vmem:[#allocation7 + $0x228] ss:$16 sps:$4 sm:$0xff]  }
 0x138   :  { %2440 = vmatpush1.bf16.msra.mxu0 %v3751_v53  ;;  %2522 = vmatpush1.bf16.msra.mxu1 %v3754_v54  ;;  %v3813_v53 = vld [vmem:[#allocation7 + $0x244] ss:$16 sps:$4 sm:$0xff]   ;;  %v3816_v54 = vld [vmem:[#allocation7 + $0x24c] ss:$16 sps:$4 sm:$0xff]  }
 0x139   :  { %2441 = vmatprep.subr.bf16.mxu0 %v3759_v55  ;;  %2523 = vmatprep.subr.bf16.mxu1 %v3762_v56  ;;  %v3811_v55 = vld [vmem:[#allocation7 + $0x240] ss:$16 sps:$4 sm:$0xff]   ;;  %v3814_v56 = vld [vmem:[#allocation7 + $0x248] ss:$16 sps:$4 sm:$0xff]  }
 0x13c   :  { %2442 = vmatpush1.bf16.msra.mxu0 %v3757_v57  ;;  %2524 = vmatpush1.bf16.msra.mxu1 %v3760_v58  ;;  %v3819_v57 = vld [vmem:[#allocation7 + $0x264] ss:$16 sps:$4 sm:$0xff]   ;;  %v3822_v58 = vld [vmem:[#allocation7 + $0x26c] ss:$16 sps:$4 sm:$0xff]  }
 0x13d   :  { %2443 = vmatprep.subr.bf16.mxu0 %v3765_v59  ;;  %2525 = vmatprep.subr.bf16.mxu1 %v3768_v60  ;;  %v3817_v59 = vld [vmem:[#allocation7 + $0x260] ss:$16 sps:$4 sm:$0xff]   ;;  %v3820_v60 = vld [vmem:[#allocation7 + $0x268] ss:$16 sps:$4 sm:$0xff]  }
 0x140   :  { %2444 = vmatpush1.bf16.msra.mxu0 %v3763_v61  ;;  %2526 = vmatpush1.bf16.msra.mxu1 %v3766_v62  ;;  %v3825_v61 = vld [vmem:[#allocation7 + $0x284] ss:$16 sps:$4 sm:$0xff]   ;;  %v3828_v62 = vld [vmem:[#allocation7 + $0x28c] ss:$16 sps:$4 sm:$0xff]  }
 0x141   :  { %2445 = vmatprep.subr.bf16.mxu0 %v3771_v63  ;;  %2527 = vmatprep.subr.bf16.mxu1 %v3774_v0  ;;  %v3823_v63 = vld [vmem:[#allocation7 + $0x280] ss:$16 sps:$4 sm:$0xff]   ;;  %v3826_v0 = vld [vmem:[#allocation7 + $0x288] ss:$16 sps:$4 sm:$0xff]  }
 0x144   :  { %2446 = vmatpush1.bf16.msra.mxu0 %v3769_v1  ;;  %2528 = vmatpush1.bf16.msra.mxu1 %v3772_v2  ;;  %v3831_v1 = vld [vmem:[#allocation7 + $0x2a4] ss:$16 sps:$4 sm:$0xff]   ;;  %v3834_v2 = vld [vmem:[#allocation7 + $0x2ac] ss:$16 sps:$4 sm:$0xff]  }
 0x145   :  { %2447 = vmatprep.subr.bf16.mxu0 %v3777_v3  ;;  %2529 = vmatprep.subr.bf16.mxu1 %v3780_v4  ;;  %v3829_v3 = vld [vmem:[#allocation7 + $0x2a0] ss:$16 sps:$4 sm:$0xff]   ;;  %v3832_v4 = vld [vmem:[#allocation7 + $0x2a8] ss:$16 sps:$4 sm:$0xff]  }
 0x148   :  { %2448 = vmatpush1.bf16.msra.mxu0 %v3775_v5  ;;  %2530 = vmatpush1.bf16.msra.mxu1 %v3778_v6  ;;  %v3837_v5 = vld [vmem:[#allocation7 + $0x2c4] ss:$16 sps:$4 sm:$0xff]   ;;  %v3840_v6 = vld [vmem:[#allocation7 + $0x2cc] ss:$16 sps:$4 sm:$0xff]  }
 0x149   :  { %2449 = vmatprep.subr.bf16.mxu0 %v3783_v7  ;;  %2531 = vmatprep.subr.bf16.mxu1 %v3786_v8  ;;  %v3835_v7 = vld [vmem:[#allocation7 + $0x2c0] ss:$16 sps:$4 sm:$0xff]   ;;  %v3838_v8 = vld [vmem:[#allocation7 + $0x2c8] ss:$16 sps:$4 sm:$0xff]  }
 0x14c   :  { %2450 = vmatpush1.bf16.msra.mxu0 %v3781_v9  ;;  %2532 = vmatpush1.bf16.msra.mxu1 %v3784_v10  ;;  %v3843_v9 = vld [vmem:[#allocation7 + $0x2e4] ss:$16 sps:$4 sm:$0xff]   ;;  %v3846_v10 = vld [vmem:[#allocation7 + $0x2ec] ss:$16 sps:$4 sm:$0xff]  }
 0x14d   :  { %2451 = vmatprep.subr.bf16.mxu0 %v3789_v11  ;;  %2533 = vmatprep.subr.bf16.mxu1 %v3792_v12  ;;  %v3841_v11 = vld [vmem:[#allocation7 + $0x2e0] ss:$16 sps:$4 sm:$0xff]   ;;  %v3844_v12 = vld [vmem:[#allocation7 + $0x2e8] ss:$16 sps:$4 sm:$0xff]  }
 0x150   :  { %2452 = vmatpush1.bf16.msra.mxu0 %v3787_v13  ;;  %2534 = vmatpush1.bf16.msra.mxu1 %v3790_v14  ;;  %v3849_v13 = vld [vmem:[#allocation7 + $0x304] ss:$16 sps:$4 sm:$0xff]   ;;  %v3852_v14 = vld [vmem:[#allocation7 + $0x30c] ss:$16 sps:$4 sm:$0xff]  }
 0x151   :  { %2453 = vmatprep.subr.bf16.mxu0 %v3795_v15  ;;  %2535 = vmatprep.subr.bf16.mxu1 %v3798_v16  ;;  %v3847_v15 = vld [vmem:[#allocation7 + $0x300] ss:$16 sps:$4 sm:$0xff]   ;;  %v3850_v16 = vld [vmem:[#allocation7 + $0x308] ss:$16 sps:$4 sm:$0xff]  }
 0x154   :  { %2454 = vmatpush1.bf16.msra.mxu0 %v3793_v17  ;;  %2536 = vmatpush1.bf16.msra.mxu1 %v3796_v18  ;;  %v3855_v17 = vld [vmem:[#allocation7 + $0x324] ss:$16 sps:$4 sm:$0xff]   ;;  %v3858_v18 = vld [vmem:[#allocation7 + $0x32c] ss:$16 sps:$4 sm:$0xff]  }
 0x155   :  { %2464 = vmatprep.subr.bf16.mxu0 %v3801_v19  ;;  %2546 = vmatprep.subr.bf16.mxu1 %v3804_v20  ;;  %v3853_v19 = vld [vmem:[#allocation7 + $0x320] ss:$16 sps:$4 sm:$0xff]   ;;  %v3856_v20 = vld [vmem:[#allocation7 + $0x328] ss:$16 sps:$4 sm:$0xff]  }
 0x1ea   :  { %v1454_v30 = vpop.f32.mrb[0].mxu0  ;;  %v4168_v31 = vpop.f32.mrb[0].mxu1 }
 0x1eb   :  { %v3359_v32 = vadd.f32 %v1454_v30, %v296_v27  ;;  %v1456_v33 = vpop.f32.mrb[1].mxu0  ;;  %v1620_v34 = vpop.f32.mrb[1].mxu1  ;;  %v3864_v27 = vld [vmem:[#allocation7 + $0x34c] ss:$16 sps:$4 sm:$0xff]   ;;  %v3867_v30 = vld [vmem:[#allocation7 + $0x364] ss:$16 sps:$4 sm:$0xff]  }
 0x1ec   :  { %v3360_v35 = vadd.f32 %v1456_v33, %v300_v28  ;;  %v3362_v36 = vadd.f32 %v1620_v34, %v308_v29  ;;  %v1458_v37 = vpop.f32.mrb[2].mxu0  ;;  %v1622_v38 = vpop.f32.mrb[2].mxu1  ;;  %v3859_v28 = vld [vmem:[#allocation7 + $0x340] ss:$16 sps:$4 sm:$0xff]   ;;  %v3862_v29 = vld [vmem:[#allocation7 + $0x348] ss:$16 sps:$4 sm:$0xff]  }
 0x1ed   :  { %v1625_v39 = vmax.f32 %v3359_v32, 0.0  ;;  %v1459_v40 = vpop.f32.mrb[3].mxu0  ;;  %v1623_v41 = vpop.f32.mrb[3].mxu1  ;;  %v3870_v32 = vld [vmem:[#allocation7 + $0x36c] ss:$16 sps:$4 sm:$0xff]  }
 0x1ee   :  { %v1626_v42 = vmax.f32 %v3360_v35, 0.0  ;;  %v1628_v43 = vmax.f32 %v3362_v36, 0.0  ;;  %v3865_v33 = vld [vmem:[#allocation7 + $0x360] ss:$16 sps:$4 sm:$0xff]   ;;  %v3868_v34 = vld [vmem:[#allocation7 + $0x368] ss:$16 sps:$4 sm:$0xff]  }
 0x1ef   :  { %v1629_v47 = vpack.c.bf16 %v1625_v39, %v1625_v39  ;;  %v3873_v35 = vld [vmem:[#allocation7 + $0x384] ss:$16 sps:$4 sm:$0xff]   ;;  %v3876_v36 = vld [vmem:[#allocation7 + $0x38c] ss:$16 sps:$4 sm:$0xff]   ;;  %v3871_v37 = vld [vmem:[#allocation7 + $0x380] ss:$16 sps:$4 sm:$0xff]  }
 0x1f0   :  { %v1630_v44 = vpack.c.bf16 %v1626_v42, %v1626_v42  ;;  %v1632_v50 = vpack.c.bf16 %v1628_v43, %v1628_v43  ;;  %v3874_v38 = vld [vmem:[#allocation7 + $0x388] ss:$16 sps:$4 sm:$0xff]   ;;  %v303_v39 = vsub.s32 2, %v4149_v22  ;;  %v3879_v40 = vld [vmem:[#allocation7 + $0x3a4] ss:$16 sps:$4 sm:$0xff]  }
 0x1f1   :  { %v3882_v41 = vld [vmem:[#allocation7 + $0x3ac] ss:$16 sps:$4 sm:$0xff]   ;;  %v3877_v42 = vld [vmem:[#allocation7 + $0x3a0] ss:$16 sps:$4 sm:$0xff]   ;;  %v3880_v43 = vld [vmem:[#allocation7 + $0x3a8] ss:$16 sps:$4 sm:$0xff]  }
 0x1f2   :  { %2455 = vmatprep.mubr.bf16.mxu0 %v1630_v44  ;;  %2537 = vmatprep.mubr.bf16.mxu1 %v1630_v44  ;;  %v304_v44 = vrot.slane %v4155_v24, %v303_v39  ;;  %v3895_v24 = vld [vmem:[#allocation8 + $0x40] sm:$0xff]  }
 0x1f3   :  { %2456 = vmatmul.mubr.bf16.vlgmr.msra.gmra.mrb[4].mxu0 %v1629_v47  ;;  %2538 = vmatmul.mubr.bf16.vlgmr.msra.gmra.mrb[4].mxu1 %v1629_v47  ;;  %v3883_v47 = vld [vmem:[#allocation7 + $0x3c0] ss:$16 sps:$4 sm:$0xff]  }
 0x1f4   :  { %2465 = vmatpush1.bf16.msra.mxu0 %v3799_v45  ;;  %2547 = vmatpush1.bf16.msra.mxu1 %v3802_v46  ;;  %v3885_v45 = vld [vmem:[#allocation7 + $0x3c4] ss:$16 sps:$4 sm:$0xff]   ;;  %v3888_v46 = vld [vmem:[#allocation7 + $0x3cc] ss:$16 sps:$4 sm:$0xff]  }
 0x1f5   :  { %2496 = vmatprep.mubr.bf16.mxu0 %v1632_v50  ;;  %2578 = vmatprep.mubr.bf16.mxu1 %v1632_v50  ;;  %v3891_v50 = vld [vmem:[#allocation7 + $0x3e4] ss:$16 sps:$4 sm:$0xff]  }
 0x1f6   :  { %2466 = vmatprep.subr.bf16.mxu0 %v3807_v48  ;;  %2548 = vmatprep.subr.bf16.mxu1 %v3810_v49  ;;  %v3886_v48 = vld [vmem:[#allocation7 + $0x3c8] ss:$16 sps:$4 sm:$0xff]   ;;  %v3361_v49 = vadd.f32 %v4168_v31, %v304_v44 }
 0x1f7   :  { %v3899_v31 = vld [vmem:[#allocation8 + $0x48] sm:$0xff]  }
 0x1f8   :  { %2467 = vmatpush1.bf16.msra.mxu0 %v3805_v51  ;;  %2549 = vmatpush1.bf16.msra.mxu1 %v3808_v52  ;;  %v3894_v51 = vld [vmem:[#allocation7 + $0x3ec] ss:$16 sps:$4 sm:$0xff]   ;;  %v3889_v52 = vld [vmem:[#allocation7 + $0x3e0] ss:$16 sps:$4 sm:$0xff]  }
 0x1f9   :  { %2468 = vmatprep.subr.bf16.mxu0 %v3813_v53  ;;  %2550 = vmatprep.subr.bf16.mxu1 %v3816_v54  ;;  %v3892_v53 = vld [vmem:[#allocation7 + $0x3e8] ss:$16 sps:$4 sm:$0xff]   ;;  %v1627_v54 = vmax.f32 %v3361_v49, 0.0 }
 0x1fc   :  { %2469 = vmatpush1.bf16.msra.mxu0 %v3811_v55  ;;  %2551 = vmatpush1.bf16.msra.mxu1 %v3814_v56  ;;  %v3896_v55 = vld [vmem:[#allocation8 + $0xc0] sm:$0xff]  }
 0x1fd   :  { %2470 = vmatprep.subr.bf16.mxu0 %v3819_v57  ;;  %2552 = vmatprep.subr.bf16.mxu1 %v3822_v58  ;;  %v3897_v56 = vld [vmem:[#allocation8] sm:$0xff]   ;;  %v1631_v58 = vpack.c.bf16 %v1627_v54, %v1627_v54 }
 0x1fe   :  { %v3898_v57 = vld [vmem:[#allocation8 + $0x80] sm:$0xff]  }
 0x200   :  { %2471 = vmatpush1.bf16.msra.mxu0 %v3817_v59  ;;  %2553 = vmatpush1.bf16.msra.mxu1 %v3820_v60  ;;  %v3900_v59 = vld [vmem:[#allocation8 + $0xc8] sm:$0xff]  }
 0x201   :  { %2472 = vmatprep.subr.bf16.mxu0 %v3825_v61  ;;  %2554 = vmatprep.subr.bf16.mxu1 %v3828_v62  ;;  %v3901_v60 = vld [vmem:[#allocation8 + $0x8] sm:$0xff]   ;;  %v3903_v62 = vld [vmem:[#allocation8 + $0x50] sm:$0xff]  }
 0x202   :  { %v3902_v61 = vld [vmem:[#allocation8 + $0x88] sm:$0xff]  }
 0x204   :  { %2473 = vmatpush1.bf16.msra.mxu0 %v3823_v63  ;;  %2555 = vmatpush1.bf16.msra.mxu1 %v3826_v0  ;;  %v3904_v63 = vld [vmem:[#allocation8 + $0xd0] sm:$0xff]  }
 0x205   :  { %2474 = vmatprep.subr.bf16.mxu0 %v3831_v1  ;;  %2556 = vmatprep.subr.bf16.mxu1 %v3834_v2  ;;  %v3905_v0 = vld [vmem:[#allocation8 + $0x10] sm:$0xff]   ;;  %v3907_v2 = vld [vmem:[#allocation8 + $0x58] sm:$0xff]  }
 0x206   :  { %v3906_v1 = vld [vmem:[#allocation8 + $0x90] sm:$0xff]  }
 0x208   :  { %2475 = vmatpush1.bf16.msra.mxu0 %v3829_v3  ;;  %2557 = vmatpush1.bf16.msra.mxu1 %v3832_v4  ;;  %v3908_v3 = vld [vmem:[#allocation8 + $0xd8] sm:$0xff]  }
 0x209   :  { %2476 = vmatprep.subr.bf16.mxu0 %v3837_v5  ;;  %2558 = vmatprep.subr.bf16.mxu1 %v3840_v6  ;;  %v3909_v4 = vld [vmem:[#allocation8 + $0x18] sm:$0xff]   ;;  %v3911_v6 = vld [vmem:[#allocation8 + $0x60] sm:$0xff]  }
 0x20a   :  { %v3910_v5 = vld [vmem:[#allocation8 + $0x98] sm:$0xff]  }
 0x20c   :  { %2477 = vmatpush1.bf16.msra.mxu0 %v3835_v7  ;;  %2559 = vmatpush1.bf16.msra.mxu1 %v3838_v8  ;;  %v3912_v7 = vld [vmem:[#allocation8 + $0xe0] sm:$0xff]  }
 0x20d   :  { %2478 = vmatprep.subr.bf16.mxu0 %v3843_v9  ;;  %2560 = vmatprep.subr.bf16.mxu1 %v3846_v10  ;;  %v3913_v8 = vld [vmem:[#allocation8 + $0x20] sm:$0xff]   ;;  %v3915_v10 = vld [vmem:[#allocation8 + $0x68] sm:$0xff]  }
 0x20e   :  { %v3914_v9 = vld [vmem:[#allocation8 + $0xa0] sm:$0xff]  }
 0x210   :  { %2479 = vmatpush1.bf16.msra.mxu0 %v3841_v11  ;;  %2561 = vmatpush1.bf16.msra.mxu1 %v3844_v12  ;;  %v3916_v11 = vld [vmem:[#allocation8 + $0xe8] sm:$0xff]  }
 0x211   :  { %2480 = vmatprep.subr.bf16.mxu0 %v3849_v13  ;;  %2562 = vmatprep.subr.bf16.mxu1 %v3852_v14  ;;  %v3917_v12 = vld [vmem:[#allocation8 + $0x28] sm:$0xff]   ;;  %v3919_v14 = vld [vmem:[#allocation8 + $0x70] sm:$0xff]  }
 0x212   :  { %v3918_v13 = vld [vmem:[#allocation8 + $0xa8] sm:$0xff]  }
 0x214   :  { %2481 = vmatpush1.bf16.msra.mxu0 %v3847_v15  ;;  %2563 = vmatpush1.bf16.msra.mxu1 %v3850_v16  ;;  %v3920_v15 = vld [vmem:[#allocation8 + $0xf0] sm:$0xff]  }
 0x215   :  { %2482 = vmatprep.subr.bf16.mxu0 %v3855_v17  ;;  %2564 = vmatprep.subr.bf16.mxu1 %v3858_v18  ;;  %v3921_v16 = vld [vmem:[#allocation8 + $0x30] sm:$0xff]   ;;  %v3923_v18 = vld [vmem:[#allocation8 + $0x78] sm:$0xff]  }
 0x216   :  { %v3922_v17 = vld [vmem:[#allocation8 + $0xb0] sm:$0xff]  }
 0x218   :  { %2483 = vmatpush1.bf16.msra.mxu0 %v3853_v19  ;;  %2565 = vmatpush1.bf16.msra.mxu1 %v3856_v20  ;;  %v3924_v19 = vld [vmem:[#allocation8 + $0xf8] sm:$0xff]  }
 0x219   :  { %2484 = vmatprep.subr.bf16.mxu0 %v3861_v21  ;;  %2566 = vmatprep.subr.bf16.mxu1 %v3864_v27  ;;  %v3925_v20 = vld [vmem:[#allocation8 + $0x38] sm:$0xff]   ;;  %v1761_v27 = vld [vmem:[%s4205_s4] sm:$0xf] }
 0x21a   :  { %v3926_v21 = vld [vmem:[#allocation8 + $0xb8] sm:$0xff]  }
 0x21c   :  { %2485 = vmatpush1.bf16.msra.mxu0 %v3859_v28  ;;  %2567 = vmatpush1.bf16.msra.mxu1 %v3862_v29  ;;  %v1766_v28 = vrot.slane %v1761_v27, %v295_v23  ;;  %v1774_v29 = vrot.slane %v1761_v27, %v303_v39 }
 0x21d   :  { %2486 = vmatprep.subr.bf16.mxu0 %v3867_v30  ;;  %2568 = vmatprep.subr.bf16.mxu1 %v3870_v32  ;;  %v1770_v30 = vrot.slane %v1761_v27, %v299_v25  ;;  %v1778_v32 = vrot.slane %v1761_v27, %v307_v26 }
 0x220   :  { %2487 = vmatpush1.bf16.msra.mxu0 %v3865_v33  ;;  %2569 = vmatpush1.bf16.msra.mxu1 %v3868_v34 }
 0x221   :  { %2488 = vmatprep.subr.bf16.mxu0 %v3873_v35  ;;  %2570 = vmatprep.subr.bf16.mxu1 %v3876_v36 }
 0x224   :  { %2489 = vmatpush1.bf16.msra.mxu0 %v3871_v37  ;;  %2571 = vmatpush1.bf16.msra.mxu1 %v3874_v38 }
 0x225   :  { %2490 = vmatprep.subr.bf16.mxu0 %v3879_v40  ;;  %2572 = vmatprep.subr.bf16.mxu1 %v3882_v41 }
 0x228   :  { %2491 = vmatpush1.bf16.msra.mxu0 %v3877_v42  ;;  %2573 = vmatpush1.bf16.msra.mxu1 %v3880_v43 }
 0x229   :  { %2492 = vmatprep.subr.bf16.mxu0 %v3885_v45  ;;  %2574 = vmatprep.subr.bf16.mxu1 %v3888_v46 }
 0x22c   :  { %2493 = vmatpush1.bf16.msra.mxu0 %v3883_v47  ;;  %2575 = vmatpush1.bf16.msra.mxu1 %v3886_v48 }
 0x22d   :  { %2494 = vmatprep.subr.bf16.mxu0 %v3891_v50  ;;  %2576 = vmatprep.subr.bf16.mxu1 %v3894_v51  ;;  %v3282_v51 = vld [vmem:[%s4207_s6] ss:$0 sm:$0xff] }
 0x230   :  { %2495 = vmatpush1.bf16.msra.mxu0 %v3889_v52  ;;  %2577 = vmatpush1.bf16.msra.mxu1 %v3892_v53 }
 0x231   :  { %3315 = vmatprep.subr.bf16.mxu0 %v3895_v24  ;;  %3337 = vmatprep.subr.bf16.mxu1 %v3896_v55 }
 0x233   :  { %2497 = vmatmul.mubr.bf16.vlgmr.msra.gmra.mrb[4].mxu0 %v1631_v58  ;;  %2579 = vmatmul.mubr.bf16.vlgmr.msra.gmra.mrb[4].mxu1 %v1631_v58 }
 0x234   :  { %3316 = vmatpush3.bf16.msra.mxu0 %v3897_v56  ;;  %3338 = vmatpush3.bf16.msra.mxu1 %v3898_v57 }
 0x235   :  { %3317 = vmatprep.subr.bf16.mxu0 %v3899_v31  ;;  %3339 = vmatprep.subr.bf16.mxu1 %v3900_v59 }
 0x238   :  { %3318 = vmatpush3.bf16.msra.mxu0 %v3901_v60  ;;  %3340 = vmatpush3.bf16.msra.mxu1 %v3902_v61 }
 0x239   :  { %3319 = vmatprep.subr.bf16.mxu0 %v3903_v62  ;;  %3341 = vmatprep.subr.bf16.mxu1 %v3904_v63 }
 0x23c   :  { %3320 = vmatpush3.bf16.msra.mxu0 %v3905_v0  ;;  %3342 = vmatpush3.bf16.msra.mxu1 %v3906_v1 }
 0x23d   :  { %3321 = vmatprep.subr.bf16.mxu0 %v3907_v2  ;;  %3343 = vmatprep.subr.bf16.mxu1 %v3908_v3 }
 0x240   :  { %3322 = vmatpush3.bf16.msra.mxu0 %v3909_v4  ;;  %3344 = vmatpush3.bf16.msra.mxu1 %v3910_v5 }
 0x241   :  { %3323 = vmatprep.subr.bf16.mxu0 %v3911_v6  ;;  %3345 = vmatprep.subr.bf16.mxu1 %v3912_v7 }
 0x244   :  { %3324 = vmatpush3.bf16.msra.mxu0 %v3913_v8  ;;  %3346 = vmatpush3.bf16.msra.mxu1 %v3914_v9 }
 0x245   :  { %3325 = vmatprep.subr.bf16.mxu0 %v3915_v10  ;;  %3347 = vmatprep.subr.bf16.mxu1 %v3916_v11 }
 0x248   :  { %3326 = vmatpush3.bf16.msra.mxu0 %v3917_v12  ;;  %3348 = vmatpush3.bf16.msra.mxu1 %v3918_v13 }
 0x249   :  { %3327 = vmatprep.subr.bf16.mxu0 %v3919_v14  ;;  %3349 = vmatprep.subr.bf16.mxu1 %v3920_v15 }
 0x24c   :  { %3328 = vmatpush3.bf16.msra.mxu0 %v3921_v16  ;;  %3350 = vmatpush3.bf16.msra.mxu1 %v3922_v17 }
 0x24d   :  { %3329 = vmatprep.subr.bf16.mxu0 %v3923_v18  ;;  %3351 = vmatprep.subr.bf16.mxu1 %v3924_v19 }
 0x250   :  { %3330 = vmatpush3.bf16.msra.mxu0 %v3925_v20  ;;  %3352 = vmatpush3.bf16.msra.mxu1 %v3926_v21 }
 0x306   :  { %v2498_v33 = vpop.f32.mrb[4].mxu0  ;;  %v2580_v34 = vpop.f32.mrb[4].mxu1 }
 0x307   :  { %v3363_v35 = vadd.f32 %v2498_v33, %v1766_v28  ;;  %v3365_v36 = vadd.f32 %v2580_v34, %v1774_v29  ;;  %v2500_v37 = vpop.f32.mrb[5].mxu0  ;;  %v2582_v38 = vpop.f32.mrb[5].mxu1 }
 0x308   :  { %v3364_v40 = vadd.f32 %v2500_v37, %v1770_v30  ;;  %v3366_v41 = vadd.f32 %v2582_v38, %v1778_v32  ;;  %v2502_v42 = vpop.f32.mrb[6].mxu0  ;;  %v2584_v43 = vpop.f32.mrb[6].mxu1 }
 0x309   :  { %v2587_v23 = vmax.f32 %v3363_v35, 0.0  ;;  %v2589_v44 = vmax.f32 %v3365_v36, 0.0  ;;  %v2503_v45 = vpop.f32.mrb[7].mxu0  ;;  %v2585_v39 = vpop.f32.mrb[7].mxu1 }
 0x30a   :  { %v2588_v46 = vmax.f32 %v3364_v40, 0.0  ;;  %v2590_v47 = vmax.f32 %v3366_v41, 0.0 }
 0x30b   :  { %v2591_v22 = vpack.c.bf16 %v2587_v23, %v2587_v23  ;;  %v2593_v26 = vpack.c.bf16 %v2589_v44, %v2589_v44 }
 0x30c   :  { %v2592_v25 = vpack.c.bf16 %v2588_v46, %v2588_v46  ;;  %v2594_v48 = vpack.c.bf16 %v2590_v47, %v2590_v47 }
 0x30e   :  { %2890 = vmatprep.mubr.bf16.mxu0 %v2592_v25  ;;  %2930 = vmatprep.mubr.bf16.mxu1 %v2594_v48 }
 0x30f   :  { %2891 = vmatmul.mubr.bf16.vlgmr.msra.gmra.mrb[8].mxu0 %v2591_v22  ;;  %2931 = vmatmul.mubr.bf16.vlgmr.msra.gmra.mrb[8].mxu1 %v2593_v26 }
 0x3e2   :  { %v3331_v49 = vpop.f32.mrb[8].mxu0  ;;  %v3353_v50 = vpop.f32.mrb[8].mxu1 }
 0x3e3   :  { %v3332_v52 = vpop.f32.mrb[9].mxu0  ;;  %v3354_v53 = vpop.f32.mrb[9].mxu1 }
 0x3e4   :  { %v3333_v54 = vadd.f32 %v3332_v52, %v3331_v49  ;;  %v3355_v24 = vadd.f32 %v3354_v53, %v3353_v50  ;;  %v3334_v55 = vpop.f32.mrb[10].mxu0  ;;  %v3356_v56 = vpop.f32.mrb[10].mxu1 }
 0x3e5   :  { %v3335_v57 = vpop.f32.mrb[11].mxu0  ;;  %v3357_v58 = vpop.f32.mrb[11].mxu1 }
 0x3e6   :  { %v2893_v31 = vadd.f32 %v3333_v54, %v3282_v51 }
 0x3e8   :  { %v2933_v59 = vadd.f32 %v3355_v24, %v2893_v31 }
 0x3ea   :  { %2938 = vst [vmem:[#allocation10] sm:$0xff] %v2933_v59 }
 0x3eb   :  { %4026 = shalt.err (!%p4023_p8)
}
 0x3ec   :  { %s4027_s10 = scalar_lea.hbm %s4208_s7, 128 }
 0x3ed   :  { %p4028_p9 = scmp.ne.s32.totalorder %s4208_s7, %s4027_s10  ;;  %p4031_p10 = scmp.lt.u32.totalorder %s4027_s10, %s4208_s7 }
 0x3ef   :  { %p4033_p11 = pnand %p4031_p10, %p4028_p9 }
 0x3f1   :  { %4036 = shalt.err (!%p4033_p11)
}
 0x3f2   :  { %2948 = dma.vmem_to_hbm [thread:$0]  %s2946_s30, 128, %s4208_s7, [#allocation4]  }
 0x3f3   :  { %4043 = dma.done.wait [#allocation4], 128  }
 0x3f4   :  { %4044 = vsyncadd [#allocation4], 4294967168 }
 0x3f5   :  { %2952 = vsyncpa [#allocation3], 1 }
 0x3f6   :  { %2953 = vsyncpa [#allocation6], 1 }
 0x3f7   :  { %2954 = vsyncpa [#allocation9], 1 }
 0x3f8   :  { %2955 = vsyncpa [#allocation4], 1 }

</bundles_post_ra>
